<compile_context>
chip_gen: v5e
topology: v5e:2x2
jax: 0.10.0
libtpu: 0.0.40
codegen_flags: <defaults>
</compile_context>

<pallas_src>
import functools

import jax
import jax.numpy as jnp
from jax.experimental import pallas as pl
from jax.experimental.pallas import tpu as pltpu


C_IN = 3
C_STEM = 32          # b0 stem channels
C_SE = 8             # squeeze-excite bottleneck (0.25 * 32)
C_PROJ = 16          # first MBConv output channels in b0
C_HEAD = 64          # head channels (1280 in real b0, scaled down)
C_PAD = 128          # lane-dense padded channel width used inside all kernels
K_STEM = 9 * C_IN    # 27 im2col taps for the stem
K_PAD = 32           # stem K padded to a clean multiple for bf16 loads

_VMEM_LIMIT = 32 * 1024 * 1024   # safe on v5e/v6e (128 MiB) and leaves headroom on v7x (64 MiB)


def _pick_tile(n, target, mult=8):
    """Largest multiple-of-`mult` divisor of n that is <= target; falls back to n (full dim).
    Shapes in this script are kept divisor-friendly; production code would pad + mask ragged tiles."""
    t = min(target, n)
    t -= t % mult
    while t >= mult:
        if n % t == 0:
            return t
        t -= mult
    return n


# --------------------------------------------------------------------------------------
# Kernel 1: stem conv (im2col matmul) + folded BN + SiLU, bf16 output
# --------------------------------------------------------------------------------------
def _stem_kernel(x_ref, w_ref, scale_ref, bias_ref, o_ref):
    # y = silu((x @ w) * scale + bias): bf16 operands, f32 MXU accumulate, bf16 store (halves HBM).
    y = jnp.dot(x_ref[...], w_ref[...], preferred_element_type=jnp.float32)
    y = y * scale_ref[...] + bias_ref[...]
    o_ref[...] = (y * jax.nn.sigmoid(y)).astype(o_ref.dtype)


def stem_conv(patches_bf16, w_bf16, scale, bias):
    M, K = patches_bf16.shape
    N = w_bf16.shape[1]
    TM = _pick_tile(M, 2048, mult=16)          # large, 16-aligned row tiles for bf16 blocks
    return pl.pallas_call(
        _stem_kernel,
        out_shape=jax.ShapeDtypeStruct((M, N), jnp.bfloat16),
        grid=(M // TM,),
        in_specs=[
            pl.BlockSpec((TM, K), lambda i: (i, 0)),
            pl.BlockSpec((K, N), lambda i: (0, 0)),
            pl.BlockSpec((1, N), lambda i: (0, 0)),
            pl.BlockSpec((1, N), lambda i: (0, 0)),
        ],
        out_specs=pl.BlockSpec((TM, N), lambda i: (i, 0)),
        compiler_params=pltpu.CompilerParams(
            dimension_semantics=("parallel",),
            vmem_limit_bytes=_VMEM_LIMIT),
    )(patches_bf16, w_bf16, scale, bias)


# --------------------------------------------------------------------------------------
# Kernel 2: fused MBConv block per image
#   depthwise 3x3 + BN + SiLU  ->  SE squeeze + gate  ->  channel gate
#   ->  folded proj+head matmul + SiLU  ->  global average pool
# Nothing except the final (B, 1, 128) feature ever leaves VMEM.
# --------------------------------------------------------------------------------------
def _mbconv_kernel(y_ref, dww_ref, dws_ref, dwb_ref,
                   w1_ref, b1_ref, w2_ref, b2_ref, wf_ref, bf_ref,
                   o_ref, yp_ref, *, Ho, Wo, C):
    # ---- depthwise 3x3 (stride 1, "same") with in-kernel halo handling ----------------
    # H halo: VMEM scratch with one zero row above/below (leading-dim stores, always aligned).
    # Halo rows are rewritten every step so megacore "parallel" partitioning stays correct.
    zero_row = jnp.zeros((1, 1, Wo, C), jnp.float32)
    yp_ref[:, 0:1, :, :] = zero_row
    yp_ref[:, Ho + 1:Ho + 2, :, :] = zero_row
    yp_ref[:, 1:Ho + 1, :, :] = y_ref[...].astype(jnp.float32)
    xp = yp_ref[...]                                              # (1, Ho+2, Wo, C)

    w = dww_ref[...]                                              # (9, C)
    ww = jax.lax.broadcasted_iota(jnp.int32, (1, Ho, Wo, C), 2)   # column index per element
    acc = jnp.zeros((1, Ho, Wo, C), jnp.float32)
    for ky in range(3):
        slab = xp[:, ky:ky + Ho, :, :]                            # rows h + ky - 1 (zero border)
        for kx in range(3):
            dx = kx - 1
            if dx == 0:
                tap = slab
            else:
                # W halo: sublane roll (XLU slot) + mask of the wrapped column (VPU).
                rolled = pltpu.roll(slab, shift=(-dx) % Wo, axis=2)
                valid = jnp.logical_and(ww + dx >= 0, ww + dx < Wo)
                tap = jnp.where(valid, rolled, jnp.zeros_like(rolled))
            wk = w[ky * 3 + kx:ky * 3 + kx + 1, :].reshape(1, 1, 1, C)
            acc = acc + tap * wk
    d = acc * dws_ref[...].reshape(1, 1, 1, C) + dwb_ref[...].reshape(1, 1, 1, C)
    d = d * jax.nn.sigmoid(d)                                     # SiLU, (1, Ho, Wo, C) f32

    # ---- squeeze-and-excite gate (both tiny matmuls, no extra launch / HBM round trip) -
    g = jnp.mean(d, axis=(1, 2))                                  # (1, C) spatial squeeze
    h = jnp.dot(g, w1_ref[...], preferred_element_type=jnp.float32) + b1_ref[...]
    h = h * jax.nn.sigmoid(h)
    s = jnp.dot(h, w2_ref[...], preferred_element_type=jnp.float32) + b2_ref[...]
    s = jax.nn.sigmoid(s)                                         # (1, C) channel gate

    # ---- channel gate -> folded proj+head matmul -> SiLU -> global average pool -------
    xg = (d * s.reshape(1, 1, 1, C)).reshape(Ho * Wo, C).astype(jnp.bfloat16)
    z = jnp.dot(xg, wf_ref[...], preferred_element_type=jnp.float32) + bf_ref[...]
    z = z * jax.nn.sigmoid(z)                                     # (Ho*Wo, C)
    o_ref[...] = (jnp.sum(z, axis=0, keepdims=True) * (1.0 / (Ho * Wo))).reshape(1, 1, C)


def mbconv_se_head_gap(y4, pp):
    B, Ho, Wo, C = y4.shape
    kern = functools.partial(_mbconv_kernel, Ho=Ho, Wo=Wo, C=C)
    return pl.pallas_call(
        kern,
        out_shape=jax.ShapeDtypeStruct((B, 1, C), jnp.float32),
        grid=(B,),
        in_specs=[
            pl.BlockSpec((1, Ho, Wo, C), lambda b: (b, 0, 0, 0)),   # stem output, bf16
            pl.BlockSpec((9, C), lambda b: (0, 0)),                 # dw weights
            pl.BlockSpec((1, C), lambda b: (0, 0)),                 # dw BN scale
            pl.BlockSpec((1, C), lambda b: (0, 0)),                 # dw BN bias
            pl.BlockSpec((C, C_SE), lambda b: (0, 0)),              # SE w1
            pl.BlockSpec((1, C_SE), lambda b: (0, 0)),              # SE b1
            pl.BlockSpec((C_SE, C), lambda b: (0, 0)),              # SE w2
            pl.BlockSpec((1, C), lambda b: (0, 0)),                 # SE b2
            pl.BlockSpec((C, C), lambda b: (0, 0)),                 # folded proj+head weight
            pl.BlockSpec((1, C), lambda b: (0, 0)),                 # folded bias
        ],
        out_specs=pl.BlockSpec((1, 1, C), lambda b: (b, 0, 0)),
        scratch_shapes=[pltpu.VMEM((1, Ho + 2, Wo, C), jnp.float32)],
        compiler_params=pltpu.CompilerParams(
            dimension_semantics=("parallel",),
            vmem_limit_bytes=_VMEM_LIMIT),
    )(y4, pp["dw_w"], pp["dw_scale"], pp["dw_bias"],
      pp["se_w1"], pp["se_b1"], pp["se_w2"], pp["se_b2"],
      pp["w_fused"], pp["b_fused"])


# --------------------------------------------------------------------------------------
# JAX glue: im2col patch extraction for the stem (pure layout work, bf16)
# --------------------------------------------------------------------------------------
def im2col(x_nhwc, k, stride, pad):
    B, H, W, C = x_nhwc.shape
    xp = jnp.pad(x_nhwc, ((0, 0), (pad, pad), (pad, pad), (0, 0)))
    Ho = (H + 2 * pad - k) // stride + 1
    Wo = (W + 2 * pad - k) // stride + 1
    cols = []
    for ky in range(k):
        for kx in range(k):
            cols.append(xp[:, ky:ky + stride * Ho:stride, kx:kx + stride * Wo:stride, :])
    return jnp.stack(cols, axis=3), Ho, Wo     # (B, Ho, Wo, k*k, C)


# --------------------------------------------------------------------------------------
# Deterministic synthetic parameters + one-time offline folding / padding / casting
# --------------------------------------------------------------------------------------
def make_params():
    key = jax.random.PRNGKey(0)
    ks = jax.random.split(key, 16)
    n = lambda k, shp, s=0.1: (s * jax.random.normal(k, shp)).astype(jnp.float32)
    bn_scale = lambda k, c: (1.0 + 0.01 * jax.random.normal(k, (c,))).astype(jnp.float32)
    bn_bias = lambda k, c: (0.01 * jax.random.normal(k, (c,))).astype(jnp.float32)
    return dict(
        stem_w=n(ks[0], (K_STEM, C_STEM)),
        stem_scale=bn_scale(ks[1], C_STEM), stem_bias=bn_bias(ks[2], C_STEM),
        dw_w=n(ks[3], (9, C_STEM)),
        dw_scale=bn_scale(ks[4], C_STEM), dw_bias=bn_bias(ks[5], C_STEM),
        se_w1=n(ks[6], (C_STEM, C_SE)), se_b1=n(ks[7], (C_SE,)),
        se_w2=n(ks[8], (C_SE, C_STEM)), se_b2=n(ks[9], (C_STEM,)),
        proj_w=n(ks[10], (C_STEM, C_PROJ)),
        proj_scale=bn_scale(ks[11], C_PROJ), proj_bias=bn_bias(ks[12], C_PROJ),
        head_w=n(ks[13], (C_PROJ, C_HEAD)),
        head_scale=bn_scale(ks[14], C_HEAD), head_bias=bn_bias(ks[15], C_HEAD),
    )


def _pad_cols(x, n):
    return jnp.pad(x, ((0, 0), (0, n - x.shape[1])))


def _pad_vec(x, n, value=0.0):
    return jnp.pad(x, (0, n - x.shape[0]), constant_values=value)


def prepare_params(p):
    """Pad channels to 128 (lane-dense), pad stem K 27->32, fold proj+head into one affine,
    pre-cast MXU weights to bf16. Padded channels carry scale=1 / bias=0 / zero weights so they
    contribute exactly 0 and are sliced off at the end."""
    pp = {}
    # stem (bf16 MXU weight, f32 folded-BN epilogue)
    pp["stem_w"] = jnp.pad(
        p["stem_w"], ((0, K_PAD - K_STEM), (0, C_PAD - C_STEM))).astype(jnp.bfloat16)   # (32, 128)
    pp["stem_scale"] = _pad_vec(p["stem_scale"], C_PAD, 1.0).reshape(1, C_PAD)
    pp["stem_bias"] = _pad_vec(p["stem_bias"], C_PAD, 0.0).reshape(1, C_PAD)
    # depthwise (elementwise -> keep f32, friendly on v5e)
    pp["dw_w"] = _pad_cols(p["dw_w"], C_PAD)                                            # (9, 128)
    pp["dw_scale"] = _pad_vec(p["dw_scale"], C_PAD, 1.0).reshape(1, C_PAD)
    pp["dw_bias"] = _pad_vec(p["dw_bias"], C_PAD, 0.0).reshape(1, C_PAD)
    # squeeze-excite (tiny, f32)
    pp["se_w1"] = jnp.pad(p["se_w1"], ((0, C_PAD - C_STEM), (0, 0)))                    # (128, 8)
    pp["se_b1"] = p["se_b1"].reshape(1, C_SE)
    pp["se_w2"] = jnp.pad(p["se_w2"], ((0, 0), (0, C_PAD - C_STEM)))                    # (8, 128)
    pp["se_b2"] = _pad_vec(p["se_b2"], C_PAD, 0.0).reshape(1, C_PAD)
    # fold proj(1x1+BN, no act) and head(1x1+BN) into one matmul:  h = silu(x @ Wf + bf)
    a = p["proj_w"] * p["proj_scale"][None, :]                                          # (32, 16)
    w_fused = (a @ p["head_w"]) * p["head_scale"][None, :]                              # (32, 64)
    b_fused = (p["proj_bias"] @ p["head_w"]) * p["head_scale"] + p["head_bias"]         # (64,)
    pp["w_fused"] = jnp.pad(
        w_fused, ((0, C_PAD - C_STEM), (0, C_PAD - C_HEAD))).astype(jnp.bfloat16)       # (128, 128)
    pp["b_fused"] = _pad_vec(b_fused, C_PAD, 0.0).reshape(1, C_PAD)
    return pp


# --------------------------------------------------------------------------------------
# Forward pass == Visual_Feature.forward: extract_features -> AdaptiveAvgPool2d(1) -> flatten(1)
# --------------------------------------------------------------------------------------
def visual_feature_forward(x_nchw, pp):
    x = jnp.transpose(x_nchw, (0, 2, 3, 1)).astype(jnp.bfloat16)      # NCHW -> NHWC, bf16 early
    B = x.shape[0]

    # --- stem: conv 3x3 / stride 2 + BN + SiLU (tiled im2col matmul, bf16 output) ---
    patches, Ho, Wo = im2col(x, k=3, stride=2, pad=1)                 # (B, Ho, Wo, 9, Cin)
    patches = patches.reshape(B * Ho * Wo, K_STEM)
    patches = jnp.pad(patches, ((0, 0), (0, K_PAD - K_STEM)))         # K 27 -> 32 (clean layout)
    y = stem_conv(patches, pp["stem_w"], pp["stem_scale"], pp["stem_bias"])   # (M, 128) bf16

    # --- fused MBConv(expand=1) + SE + folded proj/head + GAP: one launch, nothing extra in HBM ---
    y4 = y.reshape(B, Ho, Wo, C_PAD)                                  # free reshape (bf16)
    feat = mbconv_se_head_gap(y4, pp)                                 # (B, 1, 128) f32

    # drop the zero-padded channels -> flatten(start_dim=1) result
    return feat.reshape(B, C_PAD)[:, :C_HEAD]


if __name__ == "__main__":
    key = jax.random.PRNGKey(0)
    x = jax.random.normal(key, (2, C_IN, 16, 16), dtype=jnp.float32)  # NCHW like PyTorch
    params = prepare_params(make_params())
    fwd = jax.jit(visual_feature_forward)
    out = fwd(x, params)
    jax.block_until_ready(out)
    assert out.shape == (2, C_HEAD), out.shape
    assert bool(jnp.all(jnp.isfinite(out)))
    print("KERNEL_OK")
</pallas_src>

<mosaic_0001>
module attributes {stable_mosaic.version = 11 : i64} {
  func.func @_stem_kernel(%arg0: i32, %arg1: memref<128x32xbf16, #tpu.memory_space<vmem>>, %arg2: memref<32x128xbf16, #tpu.memory_space<vmem>>, %arg3: memref<1x128xf32, #tpu.memory_space<vmem>>, %arg4: memref<1x128xf32, #tpu.memory_space<vmem>>, %arg5: memref<128x128xbf16, #tpu.memory_space<vmem>>) attributes {dimension_semantics = [#tpu.dimension_semantics<parallel>], iteration_bounds = array<i64: 1>, scalar_prefetch = 0 : i64, scratch_operands = 0 : i64, tpu.core_type = #tpu.core_type<tc>, window_params = [{transform_indices = @transform_0, window_bounds = array<i64: 128, 32>}, {pipeline_mode = #tpu.pipeline_mode<synchronous>, transform_indices = @transform_1, window_bounds = array<i64: 32, 128>}, {pipeline_mode = #tpu.pipeline_mode<synchronous>, transform_indices = @transform_2, window_bounds = array<i64: 1, 128>}, {pipeline_mode = #tpu.pipeline_mode<synchronous>, transform_indices = @transform_3, window_bounds = array<i64: 1, 128>}, {transform_indices = @transform_4, window_bounds = array<i64: 128, 128>}]} {
    %c0 = arith.constant 0 : index
    %c0_0 = arith.constant 0 : index
    %0 = vector.load %arg1[%c0, %c0_0] : memref<128x32xbf16, #tpu.memory_space<vmem>>, vector<128x32xbf16>
    %c0_1 = arith.constant 0 : index
    %c0_2 = arith.constant 0 : index
    %1 = vector.load %arg2[%c0_1, %c0_2] : memref<32x128xbf16, #tpu.memory_space<vmem>>, vector<32x128xbf16>
    %cst = arith.constant dense<0.000000e+00> : vector<128x128xf32>
    %2 = tpu.matmul %0, %1, %cst {dimension_numbers = #tpu.dot_dimension_numbers<[1], [0], [0], [1], [0, 0, 1, 1], [], []>} : vector<128x32xbf16>, vector<32x128xbf16>, vector<128x128xf32> -> vector<128x128xf32>
    %c0_3 = arith.constant 0 : index
    %c0_4 = arith.constant 0 : index
    %3 = vector.load %arg3[%c0_3, %c0_4] : memref<1x128xf32, #tpu.memory_space<vmem>>, vector<1x128xf32>
    %4 = vector.broadcast %3 : vector<1x128xf32> to vector<128x128xf32>
    %5 = arith.mulf %2, %4 : vector<128x128xf32>
    %c0_5 = arith.constant 0 : index
    %c0_6 = arith.constant 0 : index
    %6 = vector.load %arg4[%c0_5, %c0_6] : memref<1x128xf32, #tpu.memory_space<vmem>>, vector<1x128xf32>
    %7 = vector.broadcast %6 : vector<1x128xf32> to vector<128x128xf32>
    %8 = arith.addf %5, %7 : vector<128x128xf32>
    %9 = arith.negf %8 : vector<128x128xf32>
    %10 = math.exp %9 : vector<128x128xf32>
    %cst_7 = arith.constant 1.000000e+00 : f32
    %11 = vector.broadcast %cst_7 : f32 to vector<128x128xf32>
    %12 = arith.addf %11, %10 : vector<128x128xf32>
    %13 = arith.divf %11, %12 : vector<128x128xf32>
    %14 = arith.mulf %8, %13 : vector<128x128xf32>
    %15 = arith.truncf %14 : vector<128x128xf32> to vector<128x128xbf16>
    %c0_8 = arith.constant 0 : index
    %c0_9 = arith.constant 0 : index
    %16 = vector.load %arg5[%c0_8, %c0_9] : memref<128x128xbf16, #tpu.memory_space<vmem>>, vector<128x128xbf16>
    tpu.vector_store %arg5[%c0_8, %c0_9], %15 {strides = array<i32>} : memref<128x128xbf16, #tpu.memory_space<vmem>>, vector<128x128xbf16>,
    return
  }
  func.func @transform_0(%arg0: i32) -> (i32, i32) {
    %c0_i32 = arith.constant 0 : i32
    %c0_i32_0 = arith.constant 0 : i32
    return %arg0, %c0_i32 : i32, i32
  }
  func.func @transform_1(%arg0: i32) -> (i32, i32) {
    %c0_i32 = arith.constant 0 : i32
    %c0_i32_0 = arith.constant 0 : i32
    %c0_i32_1 = arith.constant 0 : i32
    return %c0_i32, %c0_i32_0 : i32, i32
  }
  func.func @transform_2(%arg0: i32) -> (i32, i32) {
    %c0_i32 = arith.constant 0 : i32
    %c0_i32_0 = arith.constant 0 : i32
    %c0_i32_1 = arith.constant 0 : i32
    return %c0_i32, %c0_i32_0 : i32, i32
  }
  func.func @transform_3(%arg0: i32) -> (i32, i32) {
    %c0_i32 = arith.constant 0 : i32
    %c0_i32_0 = arith.constant 0 : i32
    %c0_i32_1 = arith.constant 0 : i32
    return %c0_i32, %c0_i32_0 : i32, i32
  }
  func.func @transform_4(%arg0: i32) -> (i32, i32) {
    %c0_i32 = arith.constant 0 : i32
    %c0_i32_0 = arith.constant 0 : i32
    return %arg0, %c0_i32 : i32, i32
  }
}

module attributes {stable_mosaic.version = 11 : i64} {
  func.func @_mbconv_kernel(%arg0: i32, %arg1: memref<1x8x8x128xbf16, #tpu.memory_space<vmem>>, %arg2: memref<9x128xf32, #tpu.memory_space<vmem>>, %arg3: memref<1x128xf32, #tpu.memory_space<vmem>>, %arg4: memref<1x128xf32, #tpu.memory_space<vmem>>, %arg5: memref<128x8xf32, #tpu.memory_space<vmem>>, %arg6: memref<1x8xf32, #tpu.memory_space<vmem>>, %arg7: memref<8x128xf32, #tpu.memory_space<vmem>>, %arg8: memref<1x128xf32, #tpu.memory_space<vmem>>, %arg9: memref<128x128xbf16, #tpu.memory_space<vmem>>, %arg10: memref<1x128xf32, #tpu.memory_space<vmem>>, %arg11: memref<1x1x128xf32, #tpu.memory_space<vmem>>, %arg12: memref<1x10x8x128xf32, #tpu.memory_space<vmem>>) attributes {dimension_semantics = [#tpu.dimension_semantics<parallel>], iteration_bounds = array<i64: 2>, scalar_prefetch = 0 : i64, scratch_operands = 1 : i64, tpu.core_type = #tpu.core_type<tc>, window_params = [{transform_indices = @transform_0, window_bounds = array<i64: 1, 8, 8, 128>}, {pipeline_mode = #tpu.pipeline_mode<synchronous>, transform_indices = @transform_1, window_bounds = array<i64: 9, 128>}, {pipeline_mode = #tpu.pipeline_mode<synchronous>, transform_indices = @transform_2, window_bounds = array<i64: 1, 128>}, {pipeline_mode = #tpu.pipeline_mode<synchronous>, transform_indices = @transform_3, window_bounds = array<i64: 1, 128>}, {pipeline_mode = #tpu.pipeline_mode<synchronous>, transform_indices = @transform_4, window_bounds = array<i64: 128, 8>}, {pipeline_mode = #tpu.pipeline_mode<synchronous>, transform_indices = @transform_5, window_bounds = array<i64: 1, 8>}, {pipeline_mode = #tpu.pipeline_mode<synchronous>, transform_indices = @transform_6, window_bounds = array<i64: 8, 128>}, {pipeline_mode = #tpu.pipeline_mode<synchronous>, transform_indices = @transform_7, window_bounds = array<i64: 1, 128>}, {pipeline_mode = #tpu.pipeline_mode<synchronous>, transform_indices = @transform_8, window_bounds = array<i64: 128, 128>}, {pipeline_mode = #tpu.pipeline_mode<synchronous>, transform_indices = @transform_9, window_bounds = array<i64: 1, 128>}, {transform_indices = @transform_10, window_bounds = array<i64: 1, 1, 128>}]} {
    %cst = arith.constant 0.000000e+00 : f32
    %0 = vector.broadcast %cst : f32 to vector<1x1x8x128xf32>
    %c0 = arith.constant 0 : index
    %c0_0 = arith.constant 0 : index
    %c0_1 = arith.constant 0 : index
    %c0_2 = arith.constant 0 : index
    %1 = vector.load %arg12[%c0, %c0_0, %c0_1, %c0_2] : memref<1x10x8x128xf32, #tpu.memory_space<vmem>>, vector<1x1x8x128xf32>
    tpu.vector_store %arg12[%c0, %c0_0, %c0_1, %c0_2], %0 {strides = array<i32>} : memref<1x10x8x128xf32, #tpu.memory_space<vmem>>, vector<1x1x8x128xf32>,
    %c0_3 = arith.constant 0 : index
    %c9 = arith.constant 9 : index
    %c0_4 = arith.constant 0 : index
    %c0_5 = arith.constant 0 : index
    %2 = vector.load %arg12[%c0_3, %c9, %c0_4, %c0_5] : memref<1x10x8x128xf32, #tpu.memory_space<vmem>>, vector<1x1x8x128xf32>
    tpu.vector_store %arg12[%c0_3, %c9, %c0_4, %c0_5], %0 {strides = array<i32>} : memref<1x10x8x128xf32, #tpu.memory_space<vmem>>, vector<1x1x8x128xf32>,
    %c0_6 = arith.constant 0 : index
    %c0_7 = arith.constant 0 : index
    %c0_8 = arith.constant 0 : index
    %c0_9 = arith.constant 0 : index
    %3 = vector.load %arg1[%c0_6, %c0_7, %c0_8, %c0_9] : memref<1x8x8x128xbf16, #tpu.memory_space<vmem>>, vector<1x8x8x128xbf16>
    %4 = arith.extf %3 : vector<1x8x8x128xbf16> to vector<1x8x8x128xf32>
    %c0_10 = arith.constant 0 : index
    %c1 = arith.constant 1 : index
    %c0_11 = arith.constant 0 : index
    %c0_12 = arith.constant 0 : index
    %5 = vector.load %arg12[%c0_10, %c1, %c0_11, %c0_12] : memref<1x10x8x128xf32, #tpu.memory_space<vmem>>, vector<1x8x8x128xf32>
    tpu.vector_store %arg12[%c0_10, %c1, %c0_11, %c0_12], %4 {strides = array<i32>} : memref<1x10x8x128xf32, #tpu.memory_space<vmem>>, vector<1x8x8x128xf32>,
    %c0_13 = arith.constant 0 : index
    %c0_14 = arith.constant 0 : index
    %c0_15 = arith.constant 0 : index
    %c0_16 = arith.constant 0 : index
    %6 = vector.load %arg12[%c0_13, %c0_14, %c0_15, %c0_16] : memref<1x10x8x128xf32, #tpu.memory_space<vmem>>, vector<1x10x8x128xf32>
    %c0_17 = arith.constant 0 : index
    %c0_18 = arith.constant 0 : index
    %7 = vector.load %arg2[%c0_17, %c0_18] : memref<9x128xf32, #tpu.memory_space<vmem>>, vector<9x128xf32>
    %8 = tpu.iota {dimensions = array<i32: 2>} : vector<1x8x8x128xi32>
    %cst_19 = arith.constant 0.000000e+00 : f32
    %9 = vector.broadcast %cst_19 : f32 to vector<1x8x8x128xf32>
    %10 = vector.extract_strided_slice %6 {offsets = [0, 0, 0, 0], sizes = [1, 8, 8, 128], strides = [1, 1, 1, 1]} : vector<1x10x8x128xf32> to vector<1x8x8x128xf32>
    %c1_i32 = arith.constant 1 : i32
    %11 = tpu.dynamic_rotate %10 by %c1_i32 dim 2 : vector<1x8x8x128xf32>, i32 -> vector<1x8x8x128xf32>
    %c-1_i32 = arith.constant -1 : i32
    %12 = vector.broadcast %c-1_i32 : i32 to vector<1x8x8x128xi32>
    %13 = arith.addi %8, %12 : vector<1x8x8x128xi32>
    %c0_i32 = arith.constant 0 : i32
    %14 = vector.broadcast %c0_i32 : i32 to vector<1x8x8x128xi32>
    %15 = arith.cmpi sge, %13, %14 : vector<1x8x8x128xi32>
    %c-1_i32_20 = arith.constant -1 : i32
    %16 = vector.broadcast %c-1_i32_20 : i32 to vector<1x8x8x128xi32>
    %17 = arith.addi %8, %16 : vector<1x8x8x128xi32>
    %c8_i32 = arith.constant 8 : i32
    %18 = vector.broadcast %c8_i32 : i32 to vector<1x8x8x128xi32>
    %19 = arith.cmpi slt, %17, %18 : vector<1x8x8x128xi32>
    %20 = arith.andi %15, %19 : vector<1x8x8x128xi1>
    %cst_21 = arith.constant 0.000000e+00 : f32
    %21 = vector.broadcast %cst_21 : f32 to vector<1x8x8x128xf32>
    %22 = arith.select %20, %11, %21 : vector<1x8x8x128xi1>, vector<1x8x8x128xf32>
    %23 = vector.extract_strided_slice %7 {offsets = [0, 0], sizes = [1, 128], strides = [1, 1]} : vector<9x128xf32> to vector<1x128xf32>
    %24 = vector.shape_cast %23 : vector<1x128xf32> to vector<1x1x1x128xf32>
    %25 = vector.broadcast %24 : vector<1x1x1x128xf32> to vector<1x8x8x128xf32>
    %26 = arith.mulf %22, %25 : vector<1x8x8x128xf32>
    %27 = arith.addf %9, %26 : vector<1x8x8x128xf32>
    %28 = vector.extract_strided_slice %7 {offsets = [1, 0], sizes = [1, 128], strides = [1, 1]} : vector<9x128xf32> to vector<1x128xf32>
    %29 = vector.shape_cast %28 : vector<1x128xf32> to vector<1x1x1x128xf32>
    %30 = vector.broadcast %29 : vector<1x1x1x128xf32> to vector<1x8x8x128xf32>
    %31 = arith.mulf %10, %30 : vector<1x8x8x128xf32>
    %32 = arith.addf %27, %31 : vector<1x8x8x128xf32>
    %c7_i32 = arith.constant 7 : i32
    %33 = tpu.dynamic_rotate %10 by %c7_i32 dim 2 : vector<1x8x8x128xf32>, i32 -> vector<1x8x8x128xf32>
    %c1_i32_22 = arith.constant 1 : i32
    %34 = vector.broadcast %c1_i32_22 : i32 to vector<1x8x8x128xi32>
    %35 = arith.addi %8, %34 : vector<1x8x8x128xi32>
    %c0_i32_23 = arith.constant 0 : i32
    %36 = vector.broadcast %c0_i32_23 : i32 to vector<1x8x8x128xi32>
    %37 = arith.cmpi sge, %35, %36 : vector<1x8x8x128xi32>
    %c1_i32_24 = arith.constant 1 : i32
    %38 = vector.broadcast %c1_i32_24 : i32 to vector<1x8x8x128xi32>
    %39 = arith.addi %8, %38 : vector<1x8x8x128xi32>
    %c8_i32_25 = arith.constant 8 : i32
    %40 = vector.broadcast %c8_i32_25 : i32 to vector<1x8x8x128xi32>
    %41 = arith.cmpi slt, %39, %40 : vector<1x8x8x128xi32>
    %42 = arith.andi %37, %41 : vector<1x8x8x128xi1>
    %cst_26 = arith.constant 0.000000e+00 : f32
    %43 = vector.broadcast %cst_26 : f32 to vector<1x8x8x128xf32>
    %44 = arith.select %42, %33, %43 : vector<1x8x8x128xi1>, vector<1x8x8x128xf32>
    %45 = vector.extract_strided_slice %7 {offsets = [2, 0], sizes = [1, 128], strides = [1, 1]} : vector<9x128xf32> to vector<1x128xf32>
    %46 = vector.shape_cast %45 : vector<1x128xf32> to vector<1x1x1x128xf32>
    %47 = vector.broadcast %46 : vector<1x1x1x128xf32> to vector<1x8x8x128xf32>
    %48 = arith.mulf %44, %47 : vector<1x8x8x128xf32>
    %49 = arith.addf %32, %48 : vector<1x8x8x128xf32>
    %50 = vector.extract_strided_slice %6 {offsets = [0, 1, 0, 0], sizes = [1, 8, 8, 128], strides = [1, 1, 1, 1]} : vector<1x10x8x128xf32> to vector<1x8x8x128xf32>
    %c1_i32_27 = arith.constant 1 : i32
    %51 = tpu.dynamic_rotate %50 by %c1_i32_27 dim 2 : vector<1x8x8x128xf32>, i32 -> vector<1x8x8x128xf32>
    %c-1_i32_28 = arith.constant -1 : i32
    %52 = vector.broadcast %c-1_i32_28 : i32 to vector<1x8x8x128xi32>
    %53 = arith.addi %8, %52 : vector<1x8x8x128xi32>
    %c0_i32_29 = arith.constant 0 : i32
    %54 = vector.broadcast %c0_i32_29 : i32 to vector<1x8x8x128xi32>
    %55 = arith.cmpi sge, %53, %54 : vector<1x8x8x128xi32>
    %c-1_i32_30 = arith.constant -1 : i32
    %56 = vector.broadcast %c-1_i32_30 : i32 to vector<1x8x8x128xi32>
    %57 = arith.addi %8, %56 : vector<1x8x8x128xi32>
    %c8_i32_31 = arith.constant 8 : i32
    %58 = vector.broadcast %c8_i32_31 : i32 to vector<1x8x8x128xi32>
    %59 = arith.cmpi slt, %57, %58 : vector<1x8x8x128xi32>
    %60 = arith.andi %55, %59 : vector<1x8x8x128xi1>
    %cst_32 = arith.constant 0.000000e+00 : f32
    %61 = vector.broadcast %cst_32 : f32 to vector<1x8x8x128xf32>
    %62 = arith.select %60, %51, %61 : vector<1x8x8x128xi1>, vector<1x8x8x128xf32>
    %63 = vector.extract_strided_slice %7 {offsets = [3, 0], sizes = [1, 128], strides = [1, 1]} : vector<9x128xf32> to vector<1x128xf32>
    %64 = vector.shape_cast %63 : vector<1x128xf32> to vector<1x1x1x128xf32>
    %65 = vector.broadcast %64 : vector<1x1x1x128xf32> to vector<1x8x8x128xf32>
    %66 = arith.mulf %62, %65 : vector<1x8x8x128xf32>
    %67 = arith.addf %49, %66 : vector<1x8x8x128xf32>
    %68 = vector.extract_strided_slice %7 {offsets = [4, 0], sizes = [1, 128], strides = [1, 1]} : vector<9x128xf32> to vector<1x128xf32>
    %69 = vector.shape_cast %68 : vector<1x128xf32> to vector<1x1x1x128xf32>
    %70 = vector.broadcast %69 : vector<1x1x1x128xf32> to vector<1x8x8x128xf32>
    %71 = arith.mulf %50, %70 : vector<1x8x8x128xf32>
    %72 = arith.addf %67, %71 : vector<1x8x8x128xf32>
    %c7_i32_33 = arith.constant 7 : i32
    %73 = tpu.dynamic_rotate %50 by %c7_i32_33 dim 2 : vector<1x8x8x128xf32>, i32 -> vector<1x8x8x128xf32>
    %c1_i32_34 = arith.constant 1 : i32
    %74 = vector.broadcast %c1_i32_34 : i32 to vector<1x8x8x128xi32>
    %75 = arith.addi %8, %74 : vector<1x8x8x128xi32>
    %c0_i32_35 = arith.constant 0 : i32
    %76 = vector.broadcast %c0_i32_35 : i32 to vector<1x8x8x128xi32>
    %77 = arith.cmpi sge, %75, %76 : vector<1x8x8x128xi32>
    %c1_i32_36 = arith.constant 1 : i32
    %78 = vector.broadcast %c1_i32_36 : i32 to vector<1x8x8x128xi32>
    %79 = arith.addi %8, %78 : vector<1x8x8x128xi32>
    %c8_i32_37 = arith.constant 8 : i32
    %80 = vector.broadcast %c8_i32_37 : i32 to vector<1x8x8x128xi32>
    %81 = arith.cmpi slt, %79, %80 : vector<1x8x8x128xi32>
    %82 = arith.andi %77, %81 : vector<1x8x8x128xi1>
    %cst_38 = arith.constant 0.000000e+00 : f32
    %83 = vector.broadcast %cst_38 : f32 to vector<1x8x8x128xf32>
    %84 = arith.select %82, %73, %83 : vector<1x8x8x128xi1>, vector<1x8x8x128xf32>
    %85 = vector.extract_strided_slice %7 {offsets = [5, 0], sizes = [1, 128], strides = [1, 1]} : vector<9x128xf32> to vector<1x128xf32>
    %86 = vector.shape_cast %85 : vector<1x128xf32> to vector<1x1x1x128xf32>
    %87 = vector.broadcast %86 : vector<1x1x1x128xf32> to vector<1x8x8x128xf32>
    %88 = arith.mulf %84, %87 : vector<1x8x8x128xf32>
    %89 = arith.addf %72, %88 : vector<1x8x8x128xf32>
    %90 = vector.extract_strided_slice %6 {offsets = [0, 2, 0, 0], sizes = [1, 8, 8, 128], strides = [1, 1, 1, 1]} : vector<1x10x8x128xf32> to vector<1x8x8x128xf32>
    %c1_i32_39 = arith.constant 1 : i32
    %91 = tpu.dynamic_rotate %90 by %c1_i32_39 dim 2 : vector<1x8x8x128xf32>, i32 -> vector<1x8x8x128xf32>
    %c-1_i32_40 = arith.constant -1 : i32
    %92 = vector.broadcast %c-1_i32_40 : i32 to vector<1x8x8x128xi32>
    %93 = arith.addi %8, %92 : vector<1x8x8x128xi32>
    %c0_i32_41 = arith.constant 0 : i32
    %94 = vector.broadcast %c0_i32_41 : i32 to vector<1x8x8x128xi32>
    %95 = arith.cmpi sge, %93, %94 : vector<1x8x8x128xi32>
    %c-1_i32_42 = arith.constant -1 : i32
    %96 = vector.broadcast %c-1_i32_42 : i32 to vector<1x8x8x128xi32>
    %97 = arith.addi %8, %96 : vector<1x8x8x128xi32>
    %c8_i32_43 = arith.constant 8 : i32
    %98 = vector.broadcast %c8_i32_43 : i32 to vector<1x8x8x128xi32>
    %99 = arith.cmpi slt, %97, %98 : vector<1x8x8x128xi32>
    %100 = arith.andi %95, %99 : vector<1x8x8x128xi1>
    %cst_44 = arith.constant 0.000000e+00 : f32
    %101 = vector.broadcast %cst_44 : f32 to vector<1x8x8x128xf32>
    %102 = arith.select %100, %91, %101 : vector<1x8x8x128xi1>, vector<1x8x8x128xf32>
    %103 = vector.extract_strided_slice %7 {offsets = [6, 0], sizes = [1, 128], strides = [1, 1]} : vector<9x128xf32> to vector<1x128xf32>
    %104 = vector.shape_cast %103 : vector<1x128xf32> to vector<1x1x1x128xf32>
    %105 = vector.broadcast %104 : vector<1x1x1x128xf32> to vector<1x8x8x128xf32>
    %106 = arith.mulf %102, %105 : vector<1x8x8x128xf32>
    %107 = arith.addf %89, %106 : vector<1x8x8x128xf32>
    %108 = vector.extract_strided_slice %7 {offsets = [7, 0], sizes = [1, 128], strides = [1, 1]} : vector<9x128xf32> to vector<1x128xf32>
    %109 = vector.shape_cast %108 : vector<1x128xf32> to vector<1x1x1x128xf32>
    %110 = vector.broadcast %109 : vector<1x1x1x128xf32> to vector<1x8x8x128xf32>
    %111 = arith.mulf %90, %110 : vector<1x8x8x128xf32>
    %112 = arith.addf %107, %111 : vector<1x8x8x128xf32>
    %c7_i32_45 = arith.constant 7 : i32
    %113 = tpu.dynamic_rotate %90 by %c7_i32_45 dim 2 : vector<1x8x8x128xf32>, i32 -> vector<1x8x8x128xf32>
    %c1_i32_46 = arith.constant 1 : i32
    %114 = vector.broadcast %c1_i32_46 : i32 to vector<1x8x8x128xi32>
    %115 = arith.addi %8, %114 : vector<1x8x8x128xi32>
    %c0_i32_47 = arith.constant 0 : i32
    %116 = vector.broadcast %c0_i32_47 : i32 to vector<1x8x8x128xi32>
    %117 = arith.cmpi sge, %115, %116 : vector<1x8x8x128xi32>
    %c1_i32_48 = arith.constant 1 : i32
    %118 = vector.broadcast %c1_i32_48 : i32 to vector<1x8x8x128xi32>
    %119 = arith.addi %8, %118 : vector<1x8x8x128xi32>
    %c8_i32_49 = arith.constant 8 : i32
    %120 = vector.broadcast %c8_i32_49 : i32 to vector<1x8x8x128xi32>
    %121 = arith.cmpi slt, %119, %120 : vector<1x8x8x128xi32>
    %122 = arith.andi %117, %121 : vector<1x8x8x128xi1>
    %cst_50 = arith.constant 0.000000e+00 : f32
    %123 = vector.broadcast %cst_50 : f32 to vector<1x8x8x128xf32>
    %124 = arith.select %122, %113, %123 : vector<1x8x8x128xi1>, vector<1x8x8x128xf32>
    %125 = vector.extract_strided_slice %7 {offsets = [8, 0], sizes = [1, 128], strides = [1, 1]} : vector<9x128xf32> to vector<1x128xf32>
    %126 = vector.shape_cast %125 : vector<1x128xf32> to vector<1x1x1x128xf32>
    %127 = vector.broadcast %126 : vector<1x1x1x128xf32> to vector<1x8x8x128xf32>
    %128 = arith.mulf %124, %127 : vector<1x8x8x128xf32>
    %129 = arith.addf %112, %128 : vector<1x8x8x128xf32>
    %c0_51 = arith.constant 0 : index
    %c0_52 = arith.constant 0 : index
    %130 = vector.load %arg3[%c0_51, %c0_52] : memref<1x128xf32, #tpu.memory_space<vmem>>, vector<1x128xf32>
    %131 = vector.shape_cast %130 : vector<1x128xf32> to vector<1x1x1x128xf32>
    %132 = vector.broadcast %131 : vector<1x1x1x128xf32> to vector<1x8x8x128xf32>
    %133 = arith.mulf %129, %132 : vector<1x8x8x128xf32>
    %c0_53 = arith.constant 0 : index
    %c0_54 = arith.constant 0 : index
    %134 = vector.load %arg4[%c0_53, %c0_54] : memref<1x128xf32, #tpu.memory_space<vmem>>, vector<1x128xf32>
    %135 = vector.shape_cast %134 : vector<1x128xf32> to vector<1x1x1x128xf32>
    %136 = vector.broadcast %135 : vector<1x1x1x128xf32> to vector<1x8x8x128xf32>
    %137 = arith.addf %133, %136 : vector<1x8x8x128xf32>
    %138 = arith.negf %137 : vector<1x8x8x128xf32>
    %139 = math.exp %138 : vector<1x8x8x128xf32>
    %cst_55 = arith.constant 1.000000e+00 : f32
    %140 = vector.broadcast %cst_55 : f32 to vector<1x8x8x128xf32>
    %141 = arith.addf %140, %139 : vector<1x8x8x128xf32>
    %142 = arith.divf %140, %141 : vector<1x8x8x128xf32>
    %143 = arith.mulf %137, %142 : vector<1x8x8x128xf32>
    %cst_56 = arith.constant dense<0.000000e+00> : vector<1x128xf32>
    %144 = vector.multi_reduction <add>, %143, %cst_56 [1, 2] : vector<1x8x8x128xf32> to vector<1x128xf32>
    %cst_57 = arith.constant 6.400000e+01 : f32
    %145 = vector.broadcast %cst_57 : f32 to vector<1x128xf32>
    %146 = arith.divf %144, %145 : vector<1x128xf32>
    %c0_58 = arith.constant 0 : index
    %c0_59 = arith.constant 0 : index
    %147 = vector.load %arg5[%c0_58, %c0_59] : memref<128x8xf32, #tpu.memory_space<vmem>>, vector<128x8xf32>
    %cst_60 = arith.constant dense<0.000000e+00> : vector<1x8xf32>
    %148 = tpu.matmul %146, %147, %cst_60 {dimension_numbers = #tpu.dot_dimension_numbers<[1], [0], [0], [1], [0, 0, 1, 1], [], []>} : vector<1x128xf32>, vector<128x8xf32>, vector<1x8xf32> -> vector<1x8xf32>
    %c0_61 = arith.constant 0 : index
    %c0_62 = arith.constant 0 : index
    %149 = vector.load %arg6[%c0_61, %c0_62] : memref<1x8xf32, #tpu.memory_space<vmem>>, vector<1x8xf32>
    %150 = arith.addf %148, %149 : vector<1x8xf32>
    %151 = arith.negf %150 : vector<1x8xf32>
    %152 = math.exp %151 : vector<1x8xf32>
    %cst_63 = arith.constant 1.000000e+00 : f32
    %153 = vector.broadcast %cst_63 : f32 to vector<1x8xf32>
    %154 = arith.addf %153, %152 : vector<1x8xf32>
    %155 = arith.divf %153, %154 : vector<1x8xf32>
    %156 = arith.mulf %150, %155 : vector<1x8xf32>
    %c0_64 = arith.constant 0 : index
    %c0_65 = arith.constant 0 : index
    %157 = vector.load %arg7[%c0_64, %c0_65] : memref<8x128xf32, #tpu.memory_space<vmem>>, vector<8x128xf32>
    %cst_66 = arith.constant dense<0.000000e+00> : vector<1x128xf32>
    %158 = tpu.matmul %156, %157, %cst_66 {dimension_numbers = #tpu.dot_dimension_numbers<[1], [0], [0], [1], [0, 0, 1, 1], [], []>} : vector<1x8xf32>, vector<8x128xf32>, vector<1x128xf32> -> vector<1x128xf32>
    %c0_67 = arith.constant 0 : index
    %c0_68 = arith.constant 0 : index
    %159 = vector.load %arg8[%c0_67, %c0_68] : memref<1x128xf32, #tpu.memory_space<vmem>>, vector<1x128xf32>
    %160 = arith.addf %158, %159 : vector<1x128xf32>
    %161 = arith.negf %160 : vector<1x128xf32>
    %162 = math.exp %161 : vector<1x128xf32>
    %cst_69 = arith.constant 1.000000e+00 : f32
    %163 = vector.broadcast %cst_69 : f32 to vector<1x128xf32>
    %164 = arith.addf %163, %162 : vector<1x128xf32>
    %165 = arith.divf %163, %164 : vector<1x128xf32>
    %166 = vector.shape_cast %165 : vector<1x128xf32> to vector<1x1x1x128xf32>
    %167 = vector.broadcast %166 : vector<1x1x1x128xf32> to vector<1x8x8x128xf32>
    %168 = arith.mulf %143, %167 : vector<1x8x8x128xf32>
    %169 = vector.shape_cast %168 : vector<1x8x8x128xf32> to vector<64x128xf32>
    %170 = arith.truncf %169 : vector<64x128xf32> to vector<64x128xbf16>
    %c0_70 = arith.constant 0 : index
    %c0_71 = arith.constant 0 : index
    %171 = vector.load %arg9[%c0_70, %c0_71] : memref<128x128xbf16, #tpu.memory_space<vmem>>, vector<128x128xbf16>
    %cst_72 = arith.constant dense<0.000000e+00> : vector<64x128xf32>
    %172 = tpu.matmul %170, %171, %cst_72 {dimension_numbers = #tpu.dot_dimension_numbers<[1], [0], [0], [1], [0, 0, 1, 1], [], []>} : vector<64x128xbf16>, vector<128x128xbf16>, vector<64x128xf32> -> vector<64x128xf32>
    %c0_73 = arith.constant 0 : index
    %c0_74 = arith.constant 0 : index
    %173 = vector.load %arg10[%c0_73, %c0_74] : memref<1x128xf32, #tpu.memory_space<vmem>>, vector<1x128xf32>
    %174 = vector.broadcast %173 : vector<1x128xf32> to vector<64x128xf32>
    %175 = arith.addf %172, %174 : vector<64x128xf32>
    %176 = arith.negf %175 : vector<64x128xf32>
    %177 = math.exp %176 : vector<64x128xf32>
    %cst_75 = arith.constant 1.000000e+00 : f32
    %178 = vector.broadcast %cst_75 : f32 to vector<64x128xf32>
    %179 = arith.addf %178, %177 : vector<64x128xf32>
    %180 = arith.divf %178, %179 : vector<64x128xf32>
    %181 = arith.mulf %175, %180 : vector<64x128xf32>
    %cst_76 = arith.constant dense<0.000000e+00> : vector<128xf32>
    %182 = vector.multi_reduction <add>, %181, %cst_76 [0] : vector<64x128xf32> to vector<128xf32>
    %183 = vector.shape_cast %182 : vector<128xf32> to vector<1x128xf32>
    %cst_77 = arith.constant 1.562500e-02 : f32
    %184 = vector.broadcast %cst_77 : f32 to vector<1x128xf32>
    %185 = arith.mulf %183, %184 : vector<1x128xf32>
    %186 = vector.shape_cast %185 : vector<1x128xf32> to vector<1x1x128xf32>
    %c0_78 = arith.constant 0 : index
    %c0_79 = arith.constant 0 : index
    %c0_80 = arith.constant 0 : index
    %187 = vector.load %arg11[%c0_78, %c0_79, %c0_80] : memref<1x1x128xf32, #tpu.memory_space<vmem>>, vector<1x1x128xf32>
    tpu.vector_store %arg11[%c0_78, %c0_79, %c0_80], %186 {strides = array<i32>} : memref<1x1x128xf32, #tpu.memory_space<vmem>>, vector<1x1x128xf32>,
    return
  }
  func.func @transform_0(%arg0: i32) -> (i32, i32, i32, i32) {
    %c0_i32 = arith.constant 0 : i32
    %c0_i32_0 = arith.constant 0 : i32
    %c0_i32_1 = arith.constant 0 : i32
    %c0_i32_2 = arith.constant 0 : i32
    return %arg0, %c0_i32, %c0_i32_0, %c0_i32_1 : i32, i32, i32, i32
  }
  func.func @transform_1(%arg0: i32) -> (i32, i32) {
    %c0_i32 = arith.constant 0 : i32
    %c0_i32_0 = arith.constant 0 : i32
    %c0_i32_1 = arith.constant 0 : i32
    return %c0_i32, %c0_i32_0 : i32, i32
  }
  func.func @transform_2(%arg0: i32) -> (i32, i32) {
    %c0_i32 = arith.constant 0 : i32
    %c0_i32_0 = arith.constant 0 : i32
    %c0_i32_1 = arith.constant 0 : i32
    return %c0_i32, %c0_i32_0 : i32, i32
  }
  func.func @transform_3(%arg0: i32) -> (i32, i32) {
    %c0_i32 = arith.constant 0 : i32
    %c0_i32_0 = arith.constant 0 : i32
    %c0_i32_1 = arith.constant 0 : i32
    return %c0_i32, %c0_i32_0 : i32, i32
  }
  func.func @transform_4(%arg0: i32) -> (i32, i32) {
    %c0_i32 = arith.constant 0 : i32
    %c0_i32_0 = arith.constant 0 : i32
    %c0_i32_1 = arith.constant 0 : i32
    return %c0_i32, %c0_i32_0 : i32, i32
  }
  func.func @transform_5(%arg0: i32) -> (i32, i32) {
    %c0_i32 = arith.constant 0 : i32
    %c0_i32_0 = arith.constant 0 : i32
    %c0_i32_1 = arith.constant 0 : i32
    return %c0_i32, %c0_i32_0 : i32, i32
  }
  func.func @transform_6(%arg0: i32) -> (i32, i32) {
    %c0_i32 = arith.constant 0 : i32
    %c0_i32_0 = arith.constant 0 : i32
    %c0_i32_1 = arith.constant 0 : i32
    return %c0_i32, %c0_i32_0 : i32, i32
  }
  func.func @transform_7(%arg0: i32) -> (i32, i32) {
    %c0_i32 = arith.constant 0 : i32
    %c0_i32_0 = arith.constant 0 : i32
    %c0_i32_1 = arith.constant 0 : i32
    return %c0_i32, %c0_i32_0 : i32, i32
  }
  func.func @transform_8(%arg0: i32) -> (i32, i32) {
    %c0_i32 = arith.constant 0 : i32
    %c0_i32_0 = arith.constant 0 : i32
    %c0_i32_1 = arith.constant 0 : i32
    return %c0_i32, %c0_i32_0 : i32, i32
  }
  func.func @transform_9(%arg0: i32) -> (i32, i32) {
    %c0_i32 = arith.constant 0 : i32
    %c0_i32_0 = arith.constant 0 : i32
    %c0_i32_1 = arith.constant 0 : i32
    return %c0_i32, %c0_i32_0 : i32, i32
  }
  func.func @transform_10(%arg0: i32) -> (i32, i32, i32) {
    %c0_i32 = arith.constant 0 : i32
    %c0_i32_0 = arith.constant 0 : i32
    %c0_i32_1 = arith.constant 0 : i32
    return %arg0, %c0_i32, %c0_i32_0 : i32, i32, i32
  }
}

</mosaic_0001>

<bundles_post_ra>
// kernel: visual_feature_forward.2
= control target key start
LH: loop header
LB: loop body
LE: loop exit
PB: predicated region body
PF: predicated region fallthrough
CT: control target
= control target key end

     0   :  { %vm90_vm0 = vcmask 261120   ;;  %s1241_s1 = inlined_call_operand.vmem [shape: bf16[32,128], index: 1, kind: input, shape index: {}]   ;;  %s1242_s0 = inlined_call_operand.vmem [shape: bf16[128,32], index: 0, kind: input, shape index: {}]   ;;  %s1243_s2 = inlined_call_operand.vmem [shape: f32[1,128], index: 2, kind: input, shape index: {}]   ;;  %s1244_s3 = inlined_call_operand.vmem [shape: f32[1,128], index: 3, kind: input, shape index: {}]   ;;  %s1245_s4 = inlined_call_operand.vmem [shape: bf16[128,128], index: 4, kind: output, shape index: {}]  }
   0x1   :  { %v633_v0 = vld [vmem:[%s1241_s1 + $0x8] sm:$0xff]  ;;  %v632_v1 = vld [vmem:[%s1241_s1] sm:$0xff]  ;;  %v626_v3 = vld [vmem:[%s1242_s0 + $0x10] sm:$0xff] }
   0x2   :  { %121 = vmatpush.bf16.msra.mxu0 %v633_v0  ;;  %681 = vmatpush.bf16.msra.mxu1 %v633_v0  ;;  %v624_v2 = vld [vmem:[%s1242_s0] sm:$0xff]  ;;  %v630_v5 = vld [vmem:[%s1242_s0 + $0x30] sm:$0xff]  ;;  %v625_v6 = vld [vmem:[%s1242_s0 + $0x8] sm:$0xff] }
   0x3   :  { %682 = vmatpush.bf16.msra.mxu2 %v633_v0  ;;  %683 = vmatpush.bf16.msra.mxu3 %v633_v0  ;;  %v628_v4 = vld [vmem:[%s1242_s0 + $0x20] sm:$0xff]  ;;  %v627_v7 = vld [vmem:[%s1242_s0 + $0x18] sm:$0xff]  ;;  %v629_v8 = vld [vmem:[%s1242_s0 + $0x28] sm:$0xff] }
   0x4   :  { %v631_v9 = vld [vmem:[%s1242_s0 + $0x38] sm:$0xff]  ;;  %v819_v10 = vld [vmem:[%s1243_s2] ss:$0 sm:$0xff] }
   0x5   :  { %v824_v11 = vld [vmem:[%s1244_s3] ss:$0 sm:$0xff] }
   0x6   :  { %122 = vmatpush.bf16.msra.mxu0 %v632_v1  ;;  %684 = vmatpush.bf16.msra.mxu1 %v632_v1 }
   0x7   :  { %685 = vmatpush.bf16.msra.mxu2 %v632_v1  ;;  %686 = vmatpush.bf16.msra.mxu3 %v632_v1 }
   0x9   :  { %600 = vmatmul.msk.bf16.vlgmr.msra.gmra.mxu0 %vm90_vm0, %v624_v2  ;;  %602 = vmatmul.msk.bf16.vlgmr.msra.gmra.mxu1 %vm90_vm0, %v626_v3 }
   0xa   :  { %604 = vmatmul.msk.bf16.vlgmr.msra.gmra.mxu2 %vm90_vm0, %v628_v4  ;;  %606 = vmatmul.msk.bf16.vlgmr.msra.gmra.mxu3 %vm90_vm0, %v630_v5 }
  0x19   :  { %601 = vmatmul.msk.bf16.gmra.mxu0 %vm90_vm0, %v625_v6  ;;  %603 = vmatmul.msk.bf16.gmra.mxu1 %vm90_vm0, %v627_v7 }
  0x1a   :  { %605 = vmatmul.msk.bf16.gmra.mxu2 %vm90_vm0, %v629_v8  ;;  %607 = vmatmul.msk.bf16.gmra.mxu3 %vm90_vm0, %v631_v9 }
  0x86   :  { %v124_v12 = vpop.f32.mrf.mxu0  ;;  %v134_v13 = vpop.f32.mrf.mxu1 }
  0x87   :  { %v168_v14 = vmul.f32 %v819_v10, %v124_v12  ;;  %v172_v15 = vmul.f32 %v819_v10, %v134_v13 }
  0x89   :  { %v829_v16 = vadd.f32 %v824_v11, %v168_v14  ;;  %v832_v17 = vadd.f32 %v824_v11, %v172_v15 }
  0x8b   :  { %v608_v18 = vmul.f32 -1.442695, %v829_v16  ;;  %v612_v19 = vmul.f32 -1.442695, %v832_v17 }
  0x8d   :  { %689 = vpow2.f32 %v608_v18  ;;  %v144_v20 = vpop.f32.mrf.mxu2  ;;  %v154_v21 = vpop.f32.mrf.mxu3 }
  0x8e   :  { %691 = vpow2.f32 %v612_v19  ;;  %v176_v22 = vmul.f32 %v819_v10, %v144_v20  ;;  %v180_v23 = vmul.f32 %v819_v10, %v154_v21  ;;  %v126_v24 = vpop.f32.mrf.mxu0  ;;  %v136_v25 = vpop.f32.mrf.mxu1 }
  0x8f   :  { %v169_v26 = vmul.f32 %v819_v10, %v126_v24  ;;  %v173_v27 = vmul.f32 %v819_v10, %v136_v25 }
  0x90   :  { %v841_v28 = vadd.f32 %v824_v11, %v176_v22  ;;  %v844_v29 = vadd.f32 %v824_v11, %v180_v23 }
  0x91   :  { %v847_v30 = vadd.f32 %v824_v11, %v169_v26  ;;  %v850_v31 = vadd.f32 %v824_v11, %v173_v27 }
  0x92   :  { %v616_v32 = vmul.f32 -1.442695, %v841_v28  ;;  %v620_v33 = vmul.f32 -1.442695, %v844_v29 }
  0x93   :  { %v690_v34 = vpop.eup %689  ;;  %v609_v37 = vmul.f32 -1.442695, %v847_v30  ;;  %v613_v39 = vmul.f32 -1.442695, %v850_v31 }
  0x94   :  { %v692_v35 = vpop.eup %691  ;;  %v252_v36 = vadd.f32 1.0, %v690_v34  ;;  %693 = vpow2.f32 %v616_v32 }
  0x95   :  { %v855_v38 = vadd.f32 1.0, %v692_v35  ;;  %695 = vpow2.f32 %v620_v33  ;;  %v146_v40 = vpop.f32.mrf.mxu2  ;;  %v156_v44 = vpop.f32.mrf.mxu3 }
  0x96   :  { %697 = vrcp.f32 %v252_v36  ;;  %v177_v41 = vmul.f32 %v819_v10, %v146_v40  ;;  %v277_v48 = vand.u32 2147483647, %v252_v36  ;;  %v279_v49 = vand.u32 2147483648, %v252_v36  ;;  %v129_v55 = vpop.f32.mrf.mxu0  ;;  %v139_v56 = vpop.f32.mrf.mxu1 }
  0x97   :  { %699 = vrcp.f32 %v855_v38  ;;  %v337_v53 = vand.u32 2147483647, %v855_v38  ;;  %v181_v54 = vmul.f32 %v819_v10, %v156_v44  ;;  %vm273_vm1 = vweird.f32 %v252_v36 }
  0x98   :  { %701 = vpow2.f32 %v609_v37  ;;  %v861_v43 = vadd.f32 %v824_v11, %v177_v41  ;;  %vm333_vm2 = vweird.f32 %v855_v38  ;;  %v339_v62 = vand.u32 2147483648, %v855_v38 }
  0x99   :  { %703 = vpow2.f32 %v613_v39  ;;  %v280_v63 = vor.u32 1.1754944e-38, %v279_v49  ;;  %v170_v1 = vmul.f32 %v819_v10, %v129_v55  ;;  %v174_v2 = vmul.f32 %v819_v10, %v139_v56 }
  0x9a   :  { %v694_v42 = vpop.eup %693  ;;  %v617_v59 = vmul.f32 -1.442695, %v861_v43  ;;  %vm884_vm3 = vcmp.eq.f32.partialorder %v277_v48, 8.507059e+37  ;;  %vm888_vm4 = vcmp.eq.f32.partialorder %v337_v53, 8.507059e+37  ;;  %v897_v8 = vadd.f32 %v824_v11, %v181_v54 }
  0x9b   :  { %v696_v45 = vpop.eup %695  ;;  %v863_v46 = vadd.f32 1.0, %v694_v42  ;;  %v340_v19 = vor.u32 1.1754944e-38, %v339_v62  ;;  %v912_v21 = vadd.f32 %v824_v11, %v170_v1  ;;  %v925_v26 = vadd.f32 %v824_v11, %v174_v2 }
  0x9c   :  { %v865_v47 = vpop.eup %697  ;;  %v867_v50 = vadd.f32 1.0, %v696_v45  ;;  %v621_v25 = vmul.f32 -1.442695, %v897_v8 }
  0x9d   :  { %v869_v51 = vpop.eup %699  ;;  %v269_v52 = vmul.f32 %v865_v47, %v252_v36  ;;  %705 = vrcp.f32 %v863_v46  ;;  %vm274_vm5 = vweird.f32 %v865_v47  ;;  %v399_v14 = vand.u32 2147483648, %v863_v46 }
  0x9e   :  { %v702_v57 = vpop.eup %701  ;;  %v329_v58 = vmul.f32 %v869_v51, %v855_v38  ;;  %707 = vrcp.f32 %v867_v50  ;;  %vm334_vm6 = vweird.f32 %v869_v51  ;;  %v459_v15 = vand.u32 2147483648, %v867_v50  ;;  %vm917_vm7 = vmor %vm273_vm1, %vm274_vm5  ;;  %v131_v23 = vpop.f32.mrf.mxu0 }
  0x9f   :  { %v704_v60 = vpop.eup %703  ;;  %v270_v61 = vsub.f32 1.0, %v269_v52  ;;  %v892_v6 = vadd.f32 1.0, %v702_v57  ;;  %709 = vpow2.f32 %v617_v59  ;;  %v397_v24 = vand.u32 2147483647, %v863_v46  ;;  %vm931_vm8 = vmor %vm333_vm2, %vm334_vm6 }
  0xa0   :  { %v330_v0 = vsub.f32 1.0, %v329_v58  ;;  %v894_v7 = vadd.f32 1.0, %v704_v60  ;;  %vm393_vm9 = vweird.f32 %v863_v46  ;;  %v457_v34 = vand.u32 2147483647, %v867_v50 }
  0xa1   :  { %v271_v3 = vmul.f32 %v865_v47, %v270_v61  ;;  %711 = vrcp.f32 %v892_v6  ;;  %v400_v37 = vor.u32 1.1754944e-38, %v399_v14  ;;  %v945_v38 = vor.u32 1.1754944e-38, %v459_v15  ;;  %v149_v61 = vpop.f32.mrf.mxu2  ;;  %v159_v15 = vpop.f32.mrf.mxu3 }
  0xa2   :  { %v331_v9 = vmul.f32 %v869_v51, %v330_v0  ;;  %713 = vrcp.f32 %v894_v7  ;;  %vm288_vm11 = vweird.f32 %v892_v6  ;;  %v292_v41 = vand.u32 2147483647, %v892_v6 }
  0xa3   :  { %v902_v12 = vpop.eup %705  ;;  %v272_v13 = vadd.f32 %v865_v47, %v271_v3  ;;  %vm951_vm12 = vcmp.eq.f32.partialorder %v397_v24, 8.507059e+37  ;;  %715 = vpow2.f32 %v621_v25  ;;  %v352_v53 = vand.u32 2147483647, %v894_v7 }
  0xa4   :  { %v332_v18 = vadd.f32 %v869_v51, %v331_v9  ;;  %v389_v20 = vmul.f32 %v902_v12, %v863_v46  ;;  %v914_v22 = vpop.eup %707  ;;  %vm394_vm10 = vweird.f32 %v902_v12  ;;  %v354_v56 = vand.u32 2147483648, %v894_v7 }
  0xa5   :  { %v449_v33 = vmul.f32 %v914_v22, %v867_v50  ;;  %v276_v35 = vsel %vm917_vm7, %v865_v47, %v272_v13  ;;  %v710_v39 = vpop.eup %709  ;;  %v294_v47 = vand.u32 2147483648, %v892_v6  ;;  %v610_v57 = vmul.f32 -1.442695, %v912_v21  ;;  %vm984_vm0 = vmor %vm393_vm9, %vm394_vm10 }
  0xa6   :  { %v390_v32 = vsub.f32 1.0, %v389_v20  ;;  %v336_v36 = vsel %vm931_vm8, %v869_v51, %v332_v18  ;;  %v956_v48 = vadd.f32 1.0, %v710_v39  ;;  %v281_v49 = vsel %vm884_vm3, %v280_v63, %v276_v35 }
  0xa7   :  { %v712_v42 = vpop.eup %711  ;;  %v450_v45 = vsub.f32 1.0, %v449_v33  ;;  %v341_v51 = vsel %vm888_vm4, %v340_v19, %v336_v36  ;;  %vm968_vm13 = vcmp.eq.f32.partialorder %v292_v41, 8.507059e+37  ;;  %vm348_vm14 = vweird.f32 %v894_v7 }
  0xa8   :  { %v391_v40 = vmul.f32 %v902_v12, %v390_v32  ;;  %v284_v52 = vmul.f32 %v712_v42, %v892_v6  ;;  %v714_v54 = vpop.eup %713  ;;  %717 = vrcp.f32 %v956_v48  ;;  %v508_v62 = vmul.f32 %v281_v49, %v829_v16 }
  0xa9   :  { %v344_v60 = vmul.f32 %v714_v54, %v894_v7  ;;  %v451_v63 = vmul.f32 %v914_v22, %v450_v45  ;;  %vm454_vm15 = vweird.f32 %v914_v22  ;;  %v295_v0 = vor.u32 1.1754944e-38, %v294_v47  ;;  %v716_v4 = vpop.eup %715 }
  0xaa   :  { %v392_v55 = vadd.f32 %v902_v12, %v391_v40  ;;  %v285_v58 = vsub.f32 1.0, %v284_v52  ;;  %v978_v1 = vmul.f32 %v341_v51, %v832_v17  ;;  %vm453_vm1 = vweird.f32 %v867_v50  ;;  %v151_v51 = vpop.f32.mrf.mxu2 }
  0xab   :  { %vm289_vm2 = vweird.f32 %v712_v42  ;;  %v345_v16 = vsub.f32 1.0, %v344_v60  ;;  %vm992_vm3 = vcmp.eq.f32.partialorder %v352_v53, 8.507059e+37  ;;  %v355_v9 = vor.u32 1.1754944e-38, %v354_v56  ;;  %vm1031_vm9 = vmor %vm453_vm1, %vm454_vm15 }
  0xac   :  { %v286_v3 = vmul.f32 %v712_v42, %v285_v58  ;;  %v396_v5 = vsel %vm984_vm0, %v902_v12, %v392_v55  ;;  %719 = vpow2.f32 %v610_v57  ;;  %vm349_vm4 = vweird.f32 %v714_v54  ;;  %vm290_vm5 = vmor %vm288_vm11, %vm289_vm2 }
  0xad   :  { %v346_v13 = vmul.f32 %v714_v54, %v345_v16  ;;  %v996_v14 = vadd.f32 1.0, %v716_v4  ;;  %v999_v19 = vadd.f32 %v914_v22, %v451_v63  ;;  %vm408_vm6 = vweird.f32 %v956_v48  ;;  %vm350_vm7 = vmor %vm348_vm14, %vm349_vm4  ;;  %v161_v16 = vpop.f32.mrf.mxu3 }
  0xae   :  { %v287_v46 = vadd.f32 %v712_v42, %v286_v3  ;;  %v718_v18 = vpop.eup %717  ;;  %v614_v12 = vmul.f32 -1.442695, %v925_v26  ;;  %v178_v20 = vmul.f32 %v819_v10, %v149_v61  ;;  %v401_v24 = vsel %vm951_vm12, %v400_v37, %v396_v5 }
  0xaf   :  { %v347_v27 = vadd.f32 %v714_v54, %v346_v13  ;;  %v404_v32 = vmul.f32 %v718_v18, %v956_v48  ;;  %v412_v6 = vand.u32 2147483647, %v956_v48  ;;  %721 = vrcp.f32 %v996_v14 }
  0xb0   :  { %v291_v25 = vsel %vm290_vm5, %v712_v42, %v287_v46  ;;  %v182_v35 = vmul.f32 %v819_v10, %v159_v15  ;;  %v171_v40 = vmul.f32 %v819_v10, %v131_v23  ;;  %v414_v44 = vand.u32 2147483648, %v956_v48 }
  0xb1   :  { %v296_v33 = vsel %vm968_vm13, %v295_v0, %v291_v25  ;;  %v351_v37 = vsel %vm350_vm7, %v714_v54, %v347_v27  ;;  %v405_v39 = vsub.f32 1.0, %v404_v32  ;;  %723 = vpow2.f32 %v614_v12 }
  0xb2   :  { %v509_v36 = vmul.f32 %v296_v33, %v847_v30  ;;  %v720_v41 = vpop.eup %719  ;;  %v356_v42 = vsel %vm992_vm3, %v355_v9, %v351_v37  ;;  %v1023_v7 = vadd.f32 %v824_v11, %v178_v20  ;;  %vm409_vm8 = vweird.f32 %v718_v18  ;;  %v141_v30 = vpop.f32.mrf.mxu1 }
  0xb3   :  { %v513_v47 = vmul.f32 %v356_v42, %v850_v31  ;;  %v406_v49 = vmul.f32 %v718_v18, %v405_v39  ;;  %v516_v52 = vmul.f32 %v401_v24, %v841_v28  ;;  %v1035_v54 = vadd.f32 1.0, %v720_v41  ;;  %vm410_vm10 = vmor %vm408_vm6, %vm409_vm8 }
  0xb4   :  { %v637_v45 = vpack.c.bf16 %v509_v36, %v508_v62  ;;  %v618_v55 = vmul.f32 -1.442695, %v1023_v7  ;;  %v1039_v31 = vadd.f32 %v824_v11, %v182_v35  ;;  %v456_v28 = vsel %vm1031_vm9, %v914_v22, %v999_v19 }
  0xb5   :  { %v647_v56 = vpack.c.bf16 %v513_v47, %v978_v1  ;;  %v407_v57 = vadd.f32 %v718_v18, %v406_v49  ;;  %v1050_v58 = vadd.f32 %v824_v11, %v171_v40  ;;  %v722_v59 = vpop.eup %721  ;;  %v415_v60 = vor.u32 1.1754944e-38, %v414_v44 }
  0xb6   :  { %638 = vst [vmem:[%s1245_s4] sm:$0xff] %v637_v45   ;;  %725 = vrcp.f32 %v1035_v54  ;;  %v175_v61 = vmul.f32 %v819_v10, %v141_v30  ;;  %v179_v22 = vmul.f32 %v819_v10, %v151_v51  ;;  %vm413_vm11 = vcmp.eq.f32.partialorder %v412_v6, 8.507059e+37 }
  0xb7   :  { %675 = vst [vmem:[%s1245_s4 + $0x10] sm:$0xff] %v647_v56   ;;  %v411_v62 = vsel %vm410_vm10, %v718_v18, %v407_v57  ;;  %v464_v63 = vmul.f32 %v722_v59, %v996_v14  ;;  %727 = vpow2.f32 %v618_v55  ;;  %v724_v0 = vpop.eup %723  ;;  %v472_v48 = vand.u32 2147483647, %v996_v14 }
  0xb8   :  { %v416_v1 = vsel %vm413_vm11, %v415_v60, %v411_v62  ;;  %v474_v2 = vand.u32 2147483648, %v996_v14  ;;  %v622_v3 = vmul.f32 -1.442695, %v1039_v31  ;;  %v1065_v17 = vadd.f32 1.0, %v724_v0 }
  0xb9   :  { %v517_v4 = vmul.f32 %v416_v1, %v861_v43  ;;  %v465_v5 = vsub.f32 1.0, %v464_v63  ;;  %v611_v9 = vmul.f32 -1.442695, %v1050_v58  ;;  %vm469_vm12 = vweird.f32 %v722_v59 }
  0xba   :  { %729 = vpow2.f32 %v622_v3  ;;  %v1069_v46 = vadd.f32 %v824_v11, %v175_v61  ;;  %v1072_v13 = vadd.f32 %v824_v11, %v179_v22  ;;  %v183_v19 = vmul.f32 %v819_v10, %v161_v16 }
  0xbb   :  { %v657_v15 = vpack.c.bf16 %v517_v4, %v516_v52  ;;  %v466_v18 = vmul.f32 %v722_v59, %v465_v5  ;;  %731 = vrcp.f32 %v1065_v17  ;;  %vm458_vm13 = vcmp.eq.f32.partialorder %v457_v34, 8.507059e+37 }
  0xbc   :  { %v1076_v43 = vpop.eup %725  ;;  %733 = vpow2.f32 %v611_v9  ;;  %v615_v12 = vmul.f32 -1.442695, %v1069_v46  ;;  %v461_v23 = vsel %vm458_vm13, %v945_v38, %v456_v28  ;;  %vm468_vm14 = vweird.f32 %v996_v14 }
  0xbd   :  { %v728_v20 = vpop.eup %727  ;;  %677 = vst [vmem:[%s1245_s4 + $0x20] sm:$0xff] %v657_v15   ;;  %v467_v24 = vadd.f32 %v722_v59, %v466_v18  ;;  %v299_v10 = vmul.f32 %v1076_v43, %v1035_v54  ;;  %vm470_vm15 = vmor %vm468_vm14, %vm469_vm12  ;;  %v475_v50 = vor.u32 1.1754944e-38, %v474_v2  ;;  %v619_v25 = vmul.f32 -1.442695, %v1072_v13 }
  0xbe   :  { %v1089_v34 = vadd.f32 1.0, %v728_v20  ;;  %735 = vpow2.f32 %v615_v12  ;;  %vm473_vm0 = vcmp.eq.f32.partialorder %v472_v48, 8.507059e+37  ;;  %v1093_v32 = vadd.f32 %v824_v11, %v183_v19 }
  0xbf   :  { %v471_v27 = vsel %vm470_vm15, %v722_v59, %v467_v24  ;;  %v300_v38 = vsub.f32 1.0, %v299_v10  ;;  %v520_v35 = vmul.f32 %v461_v23, %v844_v29  ;;  %vm303_vm1 = vweird.f32 %v1035_v54 }
  0xc0   :  { %v730_v33 = vpop.eup %729  ;;  %v476_v6 = vsel %vm473_vm0, %v475_v50, %v471_v27  ;;  %737 = vrcp.f32 %v1089_v34  ;;  %v623_v11 = vmul.f32 -1.442695, %v1093_v32  ;;  %vm304_vm2 = vweird.f32 %v1076_v43 }
  0xc1   :  { %v1096_v14 = vpop.eup %731  ;;  %v521_v36 = vmul.f32 %v476_v6, %v897_v8  ;;  %v301_v37 = vmul.f32 %v1076_v43, %v300_v38  ;;  %v1101_v39 = vadd.f32 1.0, %v730_v33  ;;  %739 = vpow2.f32 %v619_v25  ;;  %vm305_vm3 = vmor %vm303_vm1, %vm304_vm2 }
  0xc2   :  { %v734_v40 = vpop.eup %733  ;;  %v359_v41 = vmul.f32 %v1096_v14, %v1065_v17  ;;  %v309_v30 = vand.u32 2147483648, %v1035_v54  ;;  %v307_v51 = vand.u32 2147483647, %v1035_v54  ;;  %v367_v57 = vand.u32 2147483647, %v1065_v17 }
  0xc3   :  { %v667_v42 = vpack.c.bf16 %v521_v36, %v520_v35  ;;  %741 = vrcp.f32 %v1101_v39  ;;  %v302_v8 = vadd.f32 %v1076_v43, %v301_v37  ;;  %v1113_v45 = vadd.f32 1.0, %v734_v40 }
  0xc4   :  { %v736_v44 = vpop.eup %735  ;;  %v360_v29 = vsub.f32 1.0, %v359_v41  ;;  %743 = vpow2.f32 %v623_v11  ;;  %v369_v59 = vand.u32 2147483648, %v1065_v17  ;;  %v310_v54 = vor.u32 1.1754944e-38, %v309_v30 }
  0xc5   :  { %679 = vst [vmem:[%s1245_s4 + $0x30] sm:$0xff] %v667_v42   ;;  %v1115_v47 = vadd.f32 1.0, %v736_v44  ;;  %745 = vrcp.f32 %v1113_v45  ;;  %v306_v56 = vsel %vm305_vm3, %v1076_v43, %v302_v8  ;;  %v429_v60 = vand.u32 2147483648, %v1089_v34 }
  0xc6   :  { %v1117_v49 = vpop.eup %737  ;;  %v361_v55 = vmul.f32 %v1096_v14, %v360_v29  ;;  %vm308_vm4 = vcmp.eq.f32.partialorder %v307_v51, 8.507059e+37  ;;  %vm363_vm5 = vweird.f32 %v1065_v17  ;;  %vm364_vm6 = vweird.f32 %v1096_v14 }
  0xc7   :  { %v419_v52 = vmul.f32 %v1117_v49, %v1089_v34  ;;  %v740_v53 = vpop.eup %739  ;;  %747 = vrcp.f32 %v1115_v47  ;;  %v311_v62 = vsel %vm308_vm4, %v310_v54, %v306_v56  ;;  %vm1139_vm7 = vcmp.eq.f32.partialorder %v367_v57, 8.507059e+37  ;;  %vm1155_vm9 = vmor %vm363_vm5, %vm364_vm6 }
  0xc8   :  { %v362_v63 = vadd.f32 %v1096_v14, %v361_v55  ;;  %v1137_v1 = vadd.f32 1.0, %v740_v53  ;;  %v370_v3 = vor.u32 1.1754944e-38, %v369_v59  ;;  %vm423_vm8 = vweird.f32 %v1089_v34 }
  0xc9   :  { %v1125_v28 = vpop.eup %741  ;;  %v420_v22 = vsub.f32 1.0, %v419_v52  ;;  %v427_v16 = vand.u32 2147483647, %v1089_v34  ;;  %v430_v4 = vor.u32 1.1754944e-38, %v429_v60  ;;  %v1149_v18 = vmul.f32 %v311_v62, %v912_v21 }
  0xca   :  { %v744_v61 = vpop.eup %743  ;;  %v479_v0 = vmul.f32 %v1125_v28, %v1101_v39  ;;  %v489_v12 = vand.u32 2147483648, %v1101_v39  ;;  %749 = vrcp.f32 %v1137_v1  ;;  %v366_v20 = vsel %vm1155_vm9, %v1096_v14, %v362_v63 }
  0xcb   :  { %v746_v48 = vpop.eup %745  ;;  %v1146_v9 = vadd.f32 1.0, %v744_v61  ;;  %v421_v43 = vmul.f32 %v1117_v49, %v420_v22  ;;  %vm424_vm10 = vweird.f32 %v1117_v49  ;;  %v322_v17 = vand.u32 2147483647, %v1113_v45 }
  0xcc   :  { %v314_v5 = vmul.f32 %v746_v48, %v1113_v45  ;;  %v480_v21 = vsub.f32 1.0, %v479_v0  ;;  %v324_v10 = vand.u32 2147483648, %v1113_v45  ;;  %v382_v50 = vand.u32 2147483647, %v1115_v47  ;;  %vm1188_vm4 = vmor %vm423_vm8, %vm424_vm10 }
  0xcd   :  { %v748_v15 = vpop.eup %747  ;;  %vm1170_vm11 = vcmp.eq.f32.partialorder %v427_v16, 8.507059e+37  ;;  %vm483_vm12 = vweird.f32 %v1101_v39  ;;  %vm319_vm13 = vweird.f32 %v746_v48  ;;  %751 = vrcp.f32 %v1146_v9 }
  0xce   :  { %v315_v23 = vsub.f32 1.0, %v314_v5  ;;  %v374_v24 = vmul.f32 %v748_v15, %v1115_v47  ;;  %v371_v33 = vsel %vm1139_vm7, %v370_v3, %v366_v20  ;;  %v422_v6 = vadd.f32 %v1117_v49, %v421_v43 }
  0xcf   :  { %vm318_vm14 = vweird.f32 %v1113_v45  ;;  %v384_v14 = vand.u32 2147483648, %v1115_v47  ;;  %v481_v35 = vmul.f32 %v1125_v28, %v480_v21  ;;  %vm379_vm15 = vweird.f32 %v748_v15 }
  0xd0   :  { %v316_v27 = vmul.f32 %v746_v48, %v315_v23  ;;  %v375_v38 = vsub.f32 1.0, %v374_v24  ;;  %v750_v40 = vpop.eup %749  ;;  %vm484_vm0 = vweird.f32 %v1125_v28  ;;  %vm320_vm1 = vmor %vm318_vm14, %vm319_vm13  ;;  %vm323_vm2 = vcmp.eq.f32.partialorder %v322_v17, 8.507059e+37 }
  0xd1   :  { %v325_v41 = vor.u32 1.1754944e-38, %v324_v10  ;;  %vm378_vm3 = vweird.f32 %v1115_v47  ;;  %vm383_vm5 = vcmp.eq.f32.partialorder %v382_v50, 8.507059e+37  ;;  %v434_v29 = vmul.f32 %v750_v40, %v1137_v1  ;;  %vm1211_vm8 = vmor %vm483_vm12, %vm484_vm0 }
  0xd2   :  { %v317_v36 = vadd.f32 %v746_v48, %v316_v27  ;;  %v376_v37 = vmul.f32 %v748_v15, %v375_v38  ;;  %v514_v8 = vmul.f32 %v371_v33, %v925_v26  ;;  %v426_v45 = vsel %vm1188_vm4, %v1117_v49, %v422_v6  ;;  %vm380_vm6 = vmor %vm378_vm3, %vm379_vm15 }
  0xd3   :  { %v385_v30 = vor.u32 1.1754944e-38, %v384_v14  ;;  %v752_v34 = vpop.eup %751  ;;  %v482_v51 = vadd.f32 %v1125_v28, %v481_v35  ;;  %v435_v55 = vsub.f32 1.0, %v434_v29  ;;  %v442_v57 = vand.u32 2147483647, %v1137_v1 }
  0xd4   :  { %v321_v42 = vsel %vm320_vm1, %v746_v48, %v317_v36  ;;  %v377_v44 = vadd.f32 %v748_v15, %v376_v37  ;;  %v444_v26 = vand.u32 2147483648, %v1137_v1  ;;  %v494_v59 = vmul.f32 %v752_v34, %v1146_v9 }
  0xd5   :  { %v326_v47 = vsel %vm323_vm2, %v325_v41, %v321_v42  ;;  %v436_v60 = vmul.f32 %v750_v40, %v435_v55  ;;  %vm439_vm7 = vweird.f32 %v750_v40  ;;  %v431_v61 = vsel %vm1170_vm11, %v430_v4, %v426_v45 }
  0xd6   :  { %v511_v52 = vmul.f32 %v326_v47, %v1050_v58  ;;  %v381_v53 = vsel %vm380_vm6, %v748_v15, %v377_v44  ;;  %v487_v22 = vand.u32 2147483647, %v1101_v39  ;;  %vm438_vm9 = vweird.f32 %v1137_v1 }
  0xd7   :  { %v386_v56 = vsel %vm383_vm5, %v385_v30, %v381_v53  ;;  %v495_v62 = vsub.f32 1.0, %v494_v59  ;;  %v437_v0 = vadd.f32 %v750_v40, %v436_v60  ;;  %v504_v48 = vand.u32 2147483648, %v1146_v9  ;;  %vm440_vm10 = vmor %vm438_vm9, %vm439_vm7 }
  0xd8   :  { %v642_v49 = vpack.c.bf16 %v511_v52, %v1149_v18  ;;  %v515_v54 = vmul.f32 %v386_v56, %v1069_v46  ;;  %v486_v46 = vsel %vm1211_vm8, %v1125_v28, %v482_v51  ;;  %v445_v2 = vor.u32 1.1754944e-38, %v444_v26 }
  0xd9   :  { %v496_v3 = vmul.f32 %v752_v34, %v495_v62  ;;  %vm499_vm11 = vweird.f32 %v752_v34  ;;  %v502_v16 = vand.u32 2147483647, %v1146_v9  ;;  %v490_v1 = vor.u32 1.1754944e-38, %v489_v12 }
  0xda   :  { %674 = vst [vmem:[%s1245_s4 + $0x8] sm:$0xff] %v642_v49   ;;  %v652_v63 = vpack.c.bf16 %v515_v54, %v514_v8  ;;  %v441_v28 = vsel %vm440_vm10, %v750_v40, %v437_v0  ;;  %vm443_vm12 = vcmp.eq.f32.partialorder %v442_v57, 8.507059e+37  ;;  %vm488_vm13 = vcmp.eq.f32.partialorder %v487_v22, 8.507059e+37 }
  0xdb   :  { %v446_v4 = vsel %vm443_vm12, %v445_v2, %v441_v28  ;;  %v497_v5 = vadd.f32 %v752_v34, %v496_v3  ;;  %vm498_vm14 = vweird.f32 %v1146_v9  ;;  %v518_v15 = vmul.f32 %v431_v61, %v1023_v7 }
  0xdc   :  { %676 = vst [vmem:[%s1245_s4 + $0x18] sm:$0xff] %v652_v63   ;;  %v491_v18 = vsel %vm488_vm13, %v490_v1, %v486_v46  ;;  %v519_v19 = vmul.f32 %v446_v4, %v1072_v13  ;;  %vm500_vm15 = vmor %vm498_vm14, %vm499_vm11  ;;  %v505_v43 = vor.u32 1.1754944e-38, %v504_v48  ;;  %vm503_vm0 = vcmp.eq.f32.partialorder %v502_v16, 8.507059e+37 }
  0xdd   :  { %v501_v39 = vsel %vm500_vm15, %v752_v34, %v497_v5  ;;  %v522_v21 = vmul.f32 %v491_v18, %v1039_v31 }
  0xde   :  { %v662_v12 = vpack.c.bf16 %v519_v19, %v518_v15  ;;  %v506_v20 = vsel %vm503_vm0, %v505_v43, %v501_v39 }
  0xdf   :  { %v523_v23 = vmul.f32 %v506_v20, %v1093_v32 }
  0xe0   :  { %678 = vst [vmem:[%s1245_s4 + $0x28] sm:$0xff] %v662_v12  }
  0xe1   :  { %v672_v9 = vpack.c.bf16 %v523_v23, %v522_v21 }
  0xe3   :  { %680 = vst [vmem:[%s1245_s4 + $0x38] sm:$0xff] %v672_v9  }

// kernel: visual_feature_forward.3
= control target key start
LH: loop header
LB: loop body
LE: loop exit
PB: predicated region body
PF: predicated region fallthrough
CT: control target
= control target key end

     0   :  { %s2389_s0 = inlined_call_operand.vmem [shape: bf16[2,8,8,128], index: 0, kind: input, shape index: {}]   ;;  %s2390_s1 = inlined_call_operand.vmem [shape: f32[9,128], index: 1, kind: input, shape index: {}]   ;;  %s2391_s2 = inlined_call_operand.vmem [shape: f32[1,128], index: 2, kind: input, shape index: {}]   ;;  %s2392_s3 = inlined_call_operand.vmem [shape: f32[1,128], index: 3, kind: input, shape index: {}]   ;;  %s2393_s4 = inlined_call_operand.vmem [shape: f32[128,8], index: 4, kind: input, shape index: {}]   ;;  %s2394_s5 = inlined_call_operand.vmem [shape: f32[1,8], index: 5, kind: input, shape index: {}]   ;;  %s2395_s6 = inlined_call_operand.vmem [shape: f32[8,128], index: 6, kind: input, shape index: {}]   ;;  %s2396_s7 = inlined_call_operand.vmem [shape: f32[1,128], index: 7, kind: input, shape index: {}]   ;;  %s2397_s8 = inlined_call_operand.vmem [shape: bf16[128,128], index: 8, kind: input, shape index: {}]   ;;  %s2398_s9 = inlined_call_operand.vmem [shape: f32[1,128], index: 9, kind: input, shape index: {}]   ;;  %s2399_s10 = inlined_call_operand.hbm [shape: f32[2,1,128], index: 10, kind: output, shape index: {}]  }
   0x1   :  { %2400 = sst [smem:[#allocation6_spill]] %s2389_s0 }
   0x2   :  { %15 = vsyncpa [#allocation4], 0 }
   0x3   :  { %17 = vsyncpa [#allocation4 + $0x1], 0  ;;  %s1603_s13 = smov 0   ;;  %s1605_s14 = smov 0  }
   0x4   :  { %s1607_s15 = smov 0   ;;  %s1609_s16 = smov 0  }
   0x5 LB: > { %s1624_s17 = sadd.s32 4294967295, %s1544_s16   ;;  %s1260_s18 = sadd.s32 4294967294, %s1544_s16   ;;  %s1544_s16 = sphi %s1609_s16, %s2449_s16   ;;  %s1540_s15 = sphi %s1607_s15, %s2448_s15   ;;  %s1536_s14 = sphi %s1605_s14, %s2447_s14   ;;  %s1532_s13 = sphi %s1603_s13, %s2446_s13  }
   0x6   : > { %s1628_s19 = sadd.s32 1, %s1544_s16   ;;  %s245_s20 = sadd.s32 1, %s1540_s15 }
   0x7   : > { %s242_s21 = ssub.s32 %s1544_s16, %s1628_s19  ;;  %p255_p0 = scmp.ne.s32.totalorder %s1540_s15, %s1536_s14 }
   0x8   : > { %p243_p1 = scmp.eq.s32.totalorder %s242_s21, 0  ;;  %p256_p2 = scmp.eq.s32.totalorder %s1624_s17, 1 }
   0x9   : > { %p261_p3 = scmp.ne.s32.totalorder %s1536_s14, %s1532_s13  ;;  %p262_p4 = scmp.eq.s32.totalorder %s1260_s18, 1 }
   0xa   : > { %s1639_s22 = scalar_select %p243_p1, %s1540_s15, %s245_s20  }
   0xb   : > { %p1641_p5 = por %p256_p2, %p255_p0  ;;  %p1645_p6 = por %p262_p4, %p261_p3 }
   0xc   : > { %p1263_p7 = scmp.ge.s32.totalorder %s1544_s16, 1  ;;  %p315_p8 = scmp.lt.s32.totalorder %s1544_s16, 3 }
   0xe   : > { %p316_p9 = pnand %p1263_p7, %p315_p8 }
   0xf   : > { %p352_p10 = scmp.lt.s32.totalorder (!%p316_p9), %s1624_s17, 1  ;;  %s2403_s0 = sld [smem:[#allocation6_spill]] (!%p316_p9) }
  0x10   : > { %319 = sbr.rel (%p316_p9) target bundleno = 669 (0x29d), region = 60 }
  0x15   : > { %v820_v0 = vld [vmem:[%s2393_s4 + $0x78] sm:$0xff]  ;;  %v819_v1 = vld [vmem:[%s2393_s4 + $0x70] sm:$0xff]  ;;  %v397_v2 = vlaneseq  ;;  %v818_v3 = vld [vmem:[%s2393_s4 + $0x68] sm:$0xff]  ;;  %s353_s11 = scalar_select %p352_p10, %s1624_s17, 1  ;;  %v1546_v9 = vmov 0.0  }
  0x16   : > { %822 = vmatpush.msra.mxu0 %v820_v0  ;;  %v817_v5 = vld [vmem:[%s2393_s4 + $0x60] sm:$0xff]  ;;  %v816_v6 = vld [vmem:[%s2393_s4 + $0x58] sm:$0xff]  ;;  %v399_v10 = vrot.slane %v1546_v9, 7  ;;  %v1678_v11 = vrot.slane %v1546_v9, 1  ;;  %v815_v23 = vld [vmem:[%s2393_s4 + $0x50] sm:$0xff] }
  0x17   : > { %v398_v4 = vshrl.u32 %v397_v2, 7  ;;  %s1319_s25 = sshll.u32 %s353_s11, 5  ;;  %v1676_v8 = vld [vmem:[%s2390_s1] sm:$0xff]  ;;  %v814_v32 = vld [vmem:[%s2393_s4 + $0x48] sm:$0xff]  ;;  %v812_v50 = vld [vmem:[%s2393_s4 + $0x38] sm:$0xff]  ;;  %s1201_s11 = scalar_lea.hbm %s2399_s10, %s1624_s17 }
  0x18   : > { %823 = vmatpush.msra.mxu0 %v819_v1  ;;  %s356_s28 = scalar_lea.vmem %s2403_s0, %s1319_s25  ;;  %v419_v16 = vperm.slane %v1676_v8, 0  ;;  %v436_v17 = vperm.slane %v1676_v8, 1  ;;  %v813_v41 = vld [vmem:[%s2393_s4 + $0x40] sm:$0xff]  ;;  %v811_v59 = vld [vmem:[%s2393_s4 + $0x30] sm:$0xff]  ;;  %s1205_s20 = sshll.u32 %s1201_s11, 4  ;;  %s1206_s20 = int_to_ptr.hbm [resolvable:$true] %s1205_s20 }
  0x19   : > { %v1668_v7 = vadd.s32 4294967295, %v398_v4  ;;  %v1680_v12 = vadd.s32 1, %v398_v4  ;;  %v1329_v13 = vld [vmem:[%s356_s28] sm:$0xff]   ;;  %v1344_v14 = vld [vmem:[%s356_s28 + $0x8] sm:$0xff]   ;;  %v1345_v15 = vld [vmem:[%s356_s28 + $0x10] sm:$0xff]   ;;  %s1496_s25 = sshra.s32 %s1206_s20, 4  ;;  %s1497_s25 = int_to_ptr.hbm [resolvable:$true] %s1496_s25 }
  0x1a   : > { %824 = vmatpush.msra.mxu0 %v818_v3  ;;  %v1685_v18 = vunpack.c.l.bf16 %v1329_v13  ;;  %v1687_v19 = vunpack.c.h.bf16 %v1329_v13  ;;  %v1689_v20 = vunpack.c.l.bf16 %v1344_v14  ;;  %v1691_v21 = vunpack.c.h.bf16 %v1344_v14  ;;  %v1346_v22 = vld [vmem:[%s356_s28 + $0x18] sm:$0xff]   ;;  %v810_v4 = vld [vmem:[%s2393_s4 + $0x28] sm:$0xff]  ;;  %s350_s28 = sand.u32 1, %s1536_s14   ;;  %s1498_s26 = scalar_lea.hbm %s1497_s25, 1 }
  0x1b   : > { %vm408_vm0 = vcmp.ge.s32.totalorder %v1668_v7, 0  ;;  %v1696_v24 = vunpack.c.l.bf16 %v1345_v15  ;;  %v1698_v25 = vunpack.c.h.bf16 %v1345_v15  ;;  %v1700_v26 = vunpack.c.l.bf16 %v1346_v22  ;;  %s351_s12 = scalar_lea.vmem [#allocation3], %s350_s28  ;;  %s1193_s21 = scalar_lea.sflag [#allocation4], %s350_s28 }
  0x1c   : > { %825 = vmatpush.msra.mxu0 %v817_v5  ;;  %v1702_v27 = vunpack.c.h.bf16 %v1346_v22  ;;  %v400_v28 = vrot.slane %v1685_v18, 7  ;;  %v401_v29 = vrot.slane %v1687_v19, 7  ;;  %v402_v30 = vrot.slane %v1689_v20, 7  ;;  %s1203_s18 = sshll.u32 %s351_s12, 4  ;;  %p1499_p11 = scmp.ne.s32.totalorder %s1497_s25, %s1498_s26  ;;  %s1204_s18 = int_to_ptr.vmem [resolvable:$true] %s1203_s18 }
  0x1d   : > { %v403_v31 = vrot.slane %v1691_v21, 7  ;;  %v404_v33 = vrot.slane %v1696_v24, 7  ;;  %v405_v34 = vrot.slane %v1698_v25, 7  ;;  %v406_v35 = vrot.slane %v1700_v26, 7  ;;  %s1502_s17 = scalar_lea.hbm %s2399_s10, 2  ;;  %p1503_p0 = scmp.lt.s32.totalorder %s1497_s25, %s2399_s10 }
  0x1e   : > { %826 = vmatpush.msra.mxu0 %v816_v6  ;;  %v1716_v36 = vsel %vm408_vm0, %v399_v10, 0.0  ;;  %v1720_v37 = vsel %vm408_vm0, %v400_v28, 0.0  ;;  %v1724_v38 = vsel %vm408_vm0, %v401_v29, 0.0  ;;  %v1728_v39 = vsel %vm408_vm0, %v402_v30, 0.0  ;;  %p1500_p12 = pnand %p1499_p11, %p1641_p5  ;;  %p1504_p1 = scmp.lt.s32.totalorder %s1502_s17, %s1498_s26 }
  0x1f   : > { %v1732_v40 = vsel %vm408_vm0, %v403_v31, 0.0  ;;  %v1739_v42 = vsel %vm408_vm0, %v404_v33, 0.0  ;;  %v1743_v43 = vsel %vm408_vm0, %v405_v34, 0.0  ;;  %v1747_v44 = vsel %vm408_vm0, %v406_v35, 0.0  ;;  %v808_v33 = vld [vmem:[%s2393_s4 + $0x18] sm:$0xff] }
  0x20   : > { %827 = vmatpush.msra.mxu0 %v815_v23  ;;  %v420_v45 = vmul.f32 %v419_v16, %v1716_v36  ;;  %v421_v46 = vmul.f32 %v419_v16, %v1720_v37  ;;  %v422_v47 = vmul.f32 %v419_v16, %v1724_v38  ;;  %v423_v48 = vmul.f32 %v419_v16, %v1728_v39  ;;  %p1501_p13 = pneg %p1500_p12  ;;  %p1505_p2 = por %p1504_p1, %p1503_p0 }
  0x21   : > { %v424_v49 = vmul.f32 %v419_v16, %v1732_v40  ;;  %v425_v51 = vmul.f32 %v419_v16, %v1739_v42  ;;  %v426_v52 = vmul.f32 %v419_v16, %v1743_v43  ;;  %v427_v53 = vmul.f32 %v419_v16, %v1747_v44 }
  0x22   : > { %828 = vmatpush.msra.mxu0 %v814_v32  ;;  %v437_v54 = vmul.f32 0.0, %v436_v17  ;;  %v438_v55 = vmul.f32 %v1685_v18, %v436_v17  ;;  %v439_v56 = vmul.f32 %v1687_v19, %v436_v17  ;;  %v440_v57 = vmul.f32 %v1689_v20, %v436_v17  ;;  %p1506_p3 = pnand %p1505_p2, %p1501_p13 }
  0x23   : > { %v441_v58 = vmul.f32 %v1691_v21, %v436_v17  ;;  %v442_v60 = vmul.f32 %v1696_v24, %v436_v17  ;;  %v443_v61 = vmul.f32 %v1698_v25, %v436_v17  ;;  %v444_v62 = vmul.f32 %v1700_v26, %v436_v17  ;;  %v809_v17 = vld [vmem:[%s2393_s4 + $0x20] sm:$0xff] }
  0x24   : > { %829 = vmatpush.msra.mxu0 %v813_v41  ;;  %v445_v63 = vadd.f32 %v437_v54, %v420_v45  ;;  %v446_v0 = vadd.f32 %v438_v55, %v421_v46  ;;  %v447_v1 = vadd.f32 %v439_v56, %v422_v47  ;;  %v448_v2 = vadd.f32 %v440_v57, %v423_v48  ;;  %v1835_v54 = vld [vmem:[%s2390_s1 + $0x8] ss:$0 sm:$0xff] }
  0x25   : > { %v449_v3 = vadd.f32 %v441_v58, %v424_v49  ;;  %v450_v5 = vadd.f32 %v442_v60, %v425_v51  ;;  %v451_v6 = vadd.f32 %v443_v61, %v426_v52  ;;  %v452_v9 = vadd.f32 %v444_v62, %v427_v53  ;;  %v807_v49 = vld [vmem:[%s2393_s4 + $0x10] sm:$0xff] }
  0x26   : > { %830 = vmatpush.msra.mxu0 %v812_v50  ;;  %v454_v10 = vrot.slane %v1685_v18, 1  ;;  %v455_v13 = vrot.slane %v1687_v19, 1  ;;  %v456_v14 = vrot.slane %v1689_v20, 1  ;;  %v457_v15 = vrot.slane %v1691_v21, 1 }
  0x27   : > { %v458_v16 = vrot.slane %v1696_v24, 1  ;;  %v459_v22 = vrot.slane %v1698_v25, 1  ;;  %v460_v23 = vrot.slane %v1700_v26, 1  ;;  %vm463_vm1 = vcmp.lt.s32.totalorder %v1680_v12, 8 }
  0x28   : > { %831 = vmatpush.msra.mxu0 %v811_v59  ;;  %v473_v28 = vperm.slane %v1676_v8, 2  ;;  %v1788_v29 = vsel %vm463_vm1, %v1678_v11, 0.0  ;;  %v1792_v30 = vsel %vm463_vm1, %v454_v10, 0.0  ;;  %v1796_v31 = vsel %vm463_vm1, %v455_v13, 0.0  ;;  %v806_v59 = vld [vmem:[%s2393_s4 + $0x8] sm:$0xff] }
  0x29   : > { %v1800_v32 = vsel %vm463_vm1, %v456_v14, 0.0  ;;  %v1807_v11 = vsel %vm463_vm1, %v457_v15, 0.0  ;;  %v1811_v34 = vsel %vm463_vm1, %v458_v16, 0.0  ;;  %v1815_v35 = vsel %vm463_vm1, %v459_v22, 0.0 }
  0x2a   : > { %832 = vmatpush.msra.mxu0 %v810_v4  ;;  %v1819_v41 = vsel %vm463_vm1, %v460_v23, 0.0  ;;  %v474_v45 = vmul.f32 %v473_v28, %v1788_v29  ;;  %v475_v46 = vmul.f32 %v473_v28, %v1792_v30  ;;  %v476_v47 = vmul.f32 %v473_v28, %v1796_v31 }
  0x2b   : > { %v477_v48 = vmul.f32 %v473_v28, %v1800_v32  ;;  %v478_v50 = vmul.f32 %v473_v28, %v1807_v11  ;;  %v479_v51 = vmul.f32 %v473_v28, %v1811_v34  ;;  %v480_v52 = vmul.f32 %v473_v28, %v1815_v35 }
  0x2c   : > { %833 = vmatpush.msra.mxu0 %v809_v17  ;;  %v481_v53 = vmul.f32 %v473_v28, %v1819_v41  ;;  %v482_v55 = vadd.f32 %v474_v45, %v445_v63  ;;  %v483_v56 = vadd.f32 %v475_v46, %v446_v0  ;;  %v484_v57 = vadd.f32 %v476_v47, %v447_v1  ;;  %v805_v0 = vld [vmem:[%s2393_s4] sm:$0xff] }
  0x2d   : > { %v485_v58 = vadd.f32 %v477_v48, %v448_v2  ;;  %v486_v60 = vadd.f32 %v478_v50, %v449_v3  ;;  %v487_v61 = vadd.f32 %v479_v51, %v450_v5  ;;  %v488_v62 = vadd.f32 %v480_v52, %v451_v6 }
  0x2e   : > { %834 = vmatpush.msra.mxu0 %v808_v33  ;;  %v489_v4 = vadd.f32 %v481_v53, %v452_v9  ;;  %v490_v10 = vrot.slane %v1702_v27, 7  ;;  %v492_v13 = vperm.slane %v1676_v8, 3  ;;  %v509_v14 = vperm.slane %v1676_v8, 4 }
  0x2f   : > { %v526_v63 = vrot.slane %v1702_v27, 1  ;;  %v528_v1 = vperm.slane %v1676_v8, 5  ;;  %v547_v2 = vperm.slane %v1676_v8, 6  ;;  %v1850_v3 = vperm.slane %v1676_v8, 7 }
  0x30   : > { %835 = vmatpush.msra.mxu0 %v807_v49  ;;  %v1854_v5 = vmul.f32 %v1835_v54, %v1796_v31  ;;  %v491_v6 = vsel %vm408_vm0, %v490_v10, 0.0  ;;  %v493_v9 = vmul.f32 %v492_v13, %v1720_v37  ;;  %v494_v15 = vmul.f32 %v492_v13, %v1724_v38 }
  0x31   : > { %v495_v16 = vmul.f32 %v492_v13, %v1728_v39  ;;  %v496_v17 = vmul.f32 %v492_v13, %v1732_v40  ;;  %v497_v22 = vmul.f32 %v492_v13, %v1739_v42  ;;  %v498_v8 = vmul.f32 %v492_v13, %v1743_v43 }
  0x32   : > { %836 = vmatpush.msra.mxu0 %v806_v59  ;;  %v499_v23 = vmul.f32 %v492_v13, %v1747_v44  ;;  %v500_v28 = vmul.f32 %v492_v13, %v491_v6  ;;  %v501_v33 = vadd.f32 %v493_v9, %v482_v55  ;;  %v502_v45 = vadd.f32 %v494_v15, %v483_v56 }
  0x33   : > { %v503_v7 = vadd.f32 %v495_v16, %v484_v57  ;;  %v504_v46 = vadd.f32 %v496_v17, %v485_v58  ;;  %v505_v47 = vadd.f32 %v497_v22, %v486_v60  ;;  %v506_v37 = vadd.f32 %v498_v8, %v487_v61 }
  0x34   : > { %837 = vmatpush.msra.mxu0 %v805_v0  ;;  %v507_v48 = vadd.f32 %v499_v23, %v488_v62  ;;  %v508_v49 = vadd.f32 %v500_v28, %v489_v4  ;;  %v510_v50 = vmul.f32 %v1685_v18, %v509_v14  ;;  %v511_v51 = vmul.f32 %v1687_v19, %v509_v14 }
  0x35   : > { %v512_v52 = vmul.f32 %v1689_v20, %v509_v14  ;;  %v513_v53 = vmul.f32 %v1691_v21, %v509_v14  ;;  %v514_v59 = vmul.f32 %v1696_v24, %v509_v14  ;;  %v515_v10 = vmul.f32 %v1698_v25, %v509_v14 }
  0x36   : > { %v516_v55 = vmul.f32 %v1700_v26, %v509_v14  ;;  %v517_v56 = vmul.f32 %v1702_v27, %v509_v14  ;;  %v518_v57 = vadd.f32 %v510_v50, %v501_v33  ;;  %v519_v58 = vadd.f32 %v511_v51, %v502_v45 }
  0x37   : > { %v520_v60 = vadd.f32 %v512_v52, %v503_v7  ;;  %v521_v61 = vadd.f32 %v513_v53, %v504_v46  ;;  %v522_v62 = vadd.f32 %v514_v59, %v505_v47  ;;  %v523_v18 = vadd.f32 %v515_v10, %v506_v37 }
  0x38   : > { %v524_v4 = vadd.f32 %v516_v55, %v507_v48  ;;  %v525_v13 = vadd.f32 %v517_v56, %v508_v49  ;;  %v527_v0 = vsel %vm463_vm1, %v526_v63, 0.0  ;;  %v529_v9 = vmul.f32 %v528_v1, %v1792_v30 }
  0x39   : > { %v530_v15 = vmul.f32 %v528_v1, %v1796_v31  ;;  %v531_v16 = vmul.f32 %v528_v1, %v1800_v32  ;;  %v532_v17 = vmul.f32 %v528_v1, %v1807_v11  ;;  %v533_v14 = vmul.f32 %v528_v1, %v1811_v34 }
  0x3a   : > { %v534_v22 = vmul.f32 %v528_v1, %v1815_v35  ;;  %v535_v8 = vmul.f32 %v528_v1, %v1819_v41  ;;  %v536_v23 = vmul.f32 %v528_v1, %v527_v0  ;;  %v537_v28 = vadd.f32 %v529_v9, %v518_v57 }
  0x3b   : > { %v538_v33 = vadd.f32 %v530_v15, %v519_v58  ;;  %v539_v45 = vadd.f32 %v531_v16, %v520_v60  ;;  %v540_v12 = vadd.f32 %v532_v17, %v521_v61  ;;  %v541_v63 = vadd.f32 %v533_v14, %v522_v62  ;;  %v1406_v16 = vld [vmem:[%s2392_s3] ss:$0 sm:$0xff] }
  0x3c   : > { %v542_v7 = vadd.f32 %v534_v22, %v523_v18  ;;  %v543_v30 = vadd.f32 %v535_v8, %v524_v4  ;;  %v544_v46 = vadd.f32 %v536_v23, %v525_v13  ;;  %v548_v31 = vmul.f32 %v547_v2, %v1724_v38 }
  0x3d   : > { %v549_v47 = vmul.f32 %v547_v2, %v1728_v39  ;;  %v550_v37 = vmul.f32 %v547_v2, %v1732_v40  ;;  %v551_v48 = vmul.f32 %v547_v2, %v1739_v42  ;;  %v552_v49 = vmul.f32 %v547_v2, %v1743_v43 }
  0x3e   : > { %v553_v1 = vmul.f32 %v547_v2, %v1747_v44  ;;  %v554_v50 = vmul.f32 %v547_v2, %v491_v6  ;;  %v555_v51 = vmul.f32 %v547_v2, %v1716_v36  ;;  %v556_v52 = vadd.f32 %v548_v31, %v537_v28 }
  0x3f   : > { %v557_v53 = vadd.f32 %v549_v47, %v538_v33  ;;  %v558_v59 = vadd.f32 %v550_v37, %v539_v45  ;;  %v559_v10 = vadd.f32 %v551_v48, %v540_v12  ;;  %v560_v55 = vadd.f32 %v552_v49, %v541_v63 }
  0x40   : > { %v561_v56 = vadd.f32 %v553_v1, %v542_v7  ;;  %v562_v38 = vadd.f32 %v554_v50, %v543_v30  ;;  %v563_v57 = vadd.f32 %v555_v51, %v544_v46  ;;  %v565_v39 = vmul.f32 %v1687_v19, %v1850_v3 }
  0x41   : > { %v566_v40 = vmul.f32 %v1689_v20, %v1850_v3  ;;  %v567_v42 = vmul.f32 %v1691_v21, %v1850_v3  ;;  %v568_v36 = vmul.f32 %v1696_v24, %v1850_v3  ;;  %v569_v43 = vmul.f32 %v1698_v25, %v1850_v3 }
  0x42   : > { %v570_v44 = vmul.f32 %v1700_v26, %v1850_v3  ;;  %v571_v2 = vmul.f32 %v1702_v27, %v1850_v3  ;;  %v572_v19 = vmul.f32 0.0, %v1850_v3  ;;  %v573_v6 = vadd.f32 %v565_v39, %v556_v52  ;;  %v1405_v26 = vld [vmem:[%s2391_s2] ss:$0 sm:$0xff] }
  0x43   : > { %v574_v58 = vadd.f32 %v566_v40, %v557_v53  ;;  %v575_v20 = vadd.f32 %v567_v42, %v558_v59  ;;  %v576_v60 = vadd.f32 %v568_v36, %v559_v10  ;;  %v577_v61 = vadd.f32 %v569_v43, %v560_v55 }
  0x44   : > { %v578_v21 = vadd.f32 %v570_v44, %v561_v56  ;;  %v579_v62 = vadd.f32 %v571_v2, %v562_v38  ;;  %v580_v18 = vadd.f32 %v572_v19, %v563_v57  ;;  %v585_v24 = vmul.f32 %v1835_v54, %v1800_v32 }
  0x45   : > { %v586_v25 = vmul.f32 %v1835_v54, %v1807_v11  ;;  %v587_v27 = vmul.f32 %v1835_v54, %v1811_v34  ;;  %v588_v3 = vmul.f32 %v1835_v54, %v1815_v35  ;;  %v589_v4 = vmul.f32 %v1835_v54, %v1819_v41 }
  0x46   : > { %v590_v13 = vmul.f32 %v1835_v54, %v527_v0  ;;  %v591_v32 = vmul.f32 %v1835_v54, %v1788_v29  ;;  %v592_v11 = vadd.f32 %v1854_v5, %v573_v6  ;;  %v593_v9 = vadd.f32 %v585_v24, %v574_v58 }
  0x47   : > { %v594_v15 = vadd.f32 %v586_v25, %v575_v20  ;;  %v595_v34 = vadd.f32 %v587_v27, %v576_v60  ;;  %v596_v17 = vadd.f32 %v588_v3, %v577_v61  ;;  %v597_v14 = vadd.f32 %v589_v4, %v578_v21 }
  0x48   : > { %v598_v35 = vadd.f32 %v590_v13, %v579_v62  ;;  %v599_v22 = vadd.f32 %v591_v32, %v580_v18  ;;  %v604_v8 = vmul.f32 %v1405_v26, %v592_v11  ;;  %v605_v41 = vmul.f32 %v1405_v26, %v593_v9 }
  0x49   : > { %v606_v23 = vmul.f32 %v1405_v26, %v594_v15  ;;  %v607_v0 = vmul.f32 %v1405_v26, %v595_v34  ;;  %v608_v28 = vmul.f32 %v1405_v26, %v596_v17  ;;  %v609_v33 = vmul.f32 %v1405_v26, %v597_v14 }
  0x4a   : > { %v610_v29 = vmul.f32 %v1405_v26, %v598_v35  ;;  %v611_v54 = vmul.f32 %v1405_v26, %v599_v22  ;;  %v1924_v5 = vadd.f32 %v1406_v16, %v604_v8  ;;  %v1926_v45 = vadd.f32 %v1406_v16, %v605_v41 }
  0x4b   : > { %v1928_v12 = vadd.f32 %v1406_v16, %v606_v23  ;;  %v1930_v63 = vadd.f32 %v1406_v16, %v607_v0  ;;  %v1932_v7 = vadd.f32 %v1406_v16, %v608_v28  ;;  %v1934_v30 = vadd.f32 %v1406_v16, %v609_v33 }
  0x4c   : > { %v1266_v46 = vmul.f32 -1.442695, %v1924_v5  ;;  %v1267_v31 = vmul.f32 -1.442695, %v1926_v45  ;;  %v1939_v37 = vadd.f32 %v1406_v16, %v610_v29  ;;  %v1942_v49 = vadd.f32 %v1406_v16, %v611_v54 }
  0x4d   : > { %v1268_v47 = vmul.f32 -1.442695, %v1928_v12  ;;  %v1269_v48 = vmul.f32 -1.442695, %v1930_v63  ;;  %v1270_v1 = vmul.f32 -1.442695, %v1932_v7 }
  0x4e   : > { %1408 = vpow2.f32 %v1266_v46  ;;  %v1271_v50 = vmul.f32 -1.442695, %v1934_v30  ;;  %v1272_v51 = vmul.f32 -1.442695, %v1939_v37  ;;  %v1273_v52 = vmul.f32 -1.442695, %v1942_v49 }
  0x4f   : > { %1410 = vpow2.f32 %v1267_v31 }
  0x50   : > { %1412 = vpow2.f32 %v1268_v47 }
  0x51   : > { %1414 = vpow2.f32 %v1269_v48 }
  0x52   : > { %1416 = vpow2.f32 %v1270_v1 }
  0x53   : > { %1418 = vpow2.f32 %v1271_v50 }
  0x54   : > { %v1409_v53 = vpop.eup %1408  ;;  %1420 = vpow2.f32 %v1272_v51 }
  0x55   : > { %v1411_v59 = vpop.eup %1410  ;;  %v648_v10 = vadd.f32 1.0, %v1409_v53  ;;  %1422 = vpow2.f32 %v1273_v52 }
  0x56   : > { %v1413_v55 = vpop.eup %1412  ;;  %v649_v56 = vadd.f32 1.0, %v1411_v59 }
  0x57   : > { %v1415_v38 = vpop.eup %1414  ;;  %v1948_v57 = vadd.f32 1.0, %v1413_v55  ;;  %1424 = vrcp.f32 %v648_v10  ;;  %v667_v43 = vand.u32 2147483648, %v648_v10  ;;  %vm661_vm2 = vweird.f32 %v648_v10 }
  0x58   : > { %v1417_v39 = vpop.eup %1416  ;;  %v1950_v40 = vadd.f32 1.0, %v1415_v38  ;;  %1426 = vrcp.f32 %v649_v56  ;;  %v665_v2 = vand.u32 2147483647, %v648_v10  ;;  %v682_v19 = vand.u32 2147483648, %v649_v56 }
  0x59   : > { %v1419_v42 = vpop.eup %1418  ;;  %v1952_v36 = vadd.f32 1.0, %v1417_v39  ;;  %1428 = vrcp.f32 %v1948_v57  ;;  %vm676_vm3 = vweird.f32 %v649_v56  ;;  %v680_v20 = vand.u32 2147483647, %v649_v56 }
  0x5a   : > { %v1421_v44 = vpop.eup %1420  ;;  %v1955_v58 = vadd.f32 1.0, %v1419_v42  ;;  %1430 = vrcp.f32 %v1950_v40  ;;  %v1960_v61 = vor.u32 1.1754944e-38, %v667_v43  ;;  %v695_v21 = vand.u32 2147483647, %v1948_v57 }
  0x5b   : > { %v1423_v6 = vpop.eup %1422  ;;  %v697_v62 = vand.u32 2147483648, %v1948_v57  ;;  %1432 = vrcp.f32 %v1952_v36  ;;  %v1967_v24 = vadd.f32 1.0, %v1421_v44  ;;  %vm691_vm4 = vweird.f32 %v1948_v57 }
  0x5c   : > { %v710_v26 = vand.u32 2147483647, %v1950_v40  ;;  %v1972_v27 = vadd.f32 1.0, %v1423_v6  ;;  %v683_v4 = vor.u32 1.1754944e-38, %v682_v19  ;;  %vm706_vm5 = vweird.f32 %v1950_v40 }
  0x5d   : > { %v1958_v60 = vpop.eup %1424  ;;  %vm1979_vm7 = vcmp.eq.f32.partialorder %v665_v2, 8.507059e+37  ;;  %vm1983_vm8 = vcmp.eq.f32.partialorder %v680_v20, 8.507059e+37  ;;  %v712_v15 = vand.u32 2147483648, %v1950_v40  ;;  %1434 = vrcp.f32 %v1955_v58 }
  0x5e   : > { %v1965_v18 = vpop.eup %1426  ;;  %v657_v25 = vmul.f32 %v1958_v60, %v648_v10  ;;  %vm662_vm6 = vweird.f32 %v1958_v60  ;;  %vm1991_vm9 = vcmp.eq.f32.partialorder %v695_v21, 8.507059e+37  ;;  %v698_v14 = vor.u32 1.1754944e-38, %v697_v62 }
  0x5f   : > { %v672_v3 = vmul.f32 %v1965_v18, %v649_v56  ;;  %v1976_v13 = vpop.eup %1428  ;;  %vm721_vm10 = vweird.f32 %v1952_v36  ;;  %vm677_vm11 = vweird.f32 %v1965_v18  ;;  %vm1998_vm12 = vcmp.eq.f32.partialorder %v710_v26, 8.507059e+37  ;;  %vm2010_vm14 = vmor %vm661_vm2, %vm662_vm6 }
  0x60   : > { %v658_v32 = vsub.f32 1.0, %v657_v25  ;;  %v687_v34 = vmul.f32 %v1976_v13, %v1948_v57  ;;  %v1431_v35 = vpop.eup %1430  ;;  %v725_v41 = vand.u32 2147483647, %v1952_v36  ;;  %vm692_vm13 = vweird.f32 %v1976_v13  ;;  %vm2018_vm15 = vmor %vm676_vm3, %vm677_vm11 }
  0x61   : > { %v673_v16 = vsub.f32 1.0, %v672_v3  ;;  %v1433_v23 = vpop.eup %1432  ;;  %v702_v33 = vmul.f32 %v1431_v35, %v1950_v40  ;;  %v713_v46 = vor.u32 1.1754944e-38, %v712_v15  ;;  %v727_v47 = vand.u32 2147483648, %v1952_v36  ;;  %vm2025_vm1 = vmor %vm691_vm4, %vm692_vm13 }
  0x62   : > { %v659_v22 = vmul.f32 %v1958_v60, %v658_v32  ;;  %v688_v28 = vsub.f32 1.0, %v687_v34  ;;  %v717_v31 = vmul.f32 %v1433_v23, %v1952_v36  ;;  %vm707_vm0 = vweird.f32 %v1431_v35 }
  0x63   : > { %v674_v0 = vmul.f32 %v1965_v18, %v673_v16  ;;  %v703_v51 = vsub.f32 1.0, %v702_v33  ;;  %v1435_v52 = vpop.eup %1434  ;;  %vm722_vm2 = vweird.f32 %v1433_v23  ;;  %v740_v10 = vand.u32 2147483647, %v1955_v58  ;;  %vm2045_vm4 = vmor %vm706_vm5, %vm707_vm0 }
  0x64   : > { %v660_v29 = vadd.f32 %v1958_v60, %v659_v22  ;;  %v689_v50 = vmul.f32 %v1976_v13, %v688_v28  ;;  %v718_v59 = vsub.f32 1.0, %v717_v31  ;;  %1436 = vrcp.f32 %v1967_v24  ;;  %vm2055_vm11 = vmor %vm721_vm10, %vm722_vm2 }
  0x65   : > { %v675_v48 = vadd.f32 %v1965_v18, %v674_v0  ;;  %v704_v56 = vmul.f32 %v1431_v35, %v703_v51  ;;  %vm2032_vm3 = vcmp.eq.f32.partialorder %v725_v41, 8.507059e+37  ;;  %vm736_vm6 = vweird.f32 %v1955_v58 }
  0x66   : > { %v690_v55 = vadd.f32 %v1976_v13, %v689_v50  ;;  %v664_v57 = vsel %vm2010_vm14, %v1958_v60, %v660_v29  ;;  %v719_v43 = vmul.f32 %v1433_v23, %v718_v59  ;;  %v732_v44 = vmul.f32 %v1435_v52, %v1955_v58 }
  0x67   : > { %v679_v39 = vsel %vm2018_vm15, %v1965_v18, %v675_v48  ;;  %v705_v19 = vadd.f32 %v1431_v35, %v704_v56  ;;  %v728_v20 = vor.u32 1.1754944e-38, %v727_v47  ;;  %v742_v40 = vand.u32 2147483648, %v1955_v58 }
  0x68   : > { %v694_v2 = vsel %vm2025_vm1, %v1976_v13, %v690_v55  ;;  %v720_v60 = vadd.f32 %v1433_v23, %v719_v43  ;;  %v733_v21 = vsub.f32 1.0, %v732_v44  ;;  %vm737_vm5 = vweird.f32 %v1435_v52 }
  0x69   : > { %vm2060_vm13 = vcmp.eq.f32.partialorder %v740_v10, 8.507059e+37  ;;  %v669_v18 = vsel %vm1979_vm7, %v1960_v61, %v664_v57  ;;  %v684_v36 = vsel %vm1983_vm8, %v683_v4, %v679_v39  ;;  %v709_v25 = vsel %vm2045_vm4, %v1431_v35, %v705_v19  ;;  %vm2081_vm7 = vmor %vm736_vm6, %vm737_vm5 }
  0x6a   : > { %1438 = vrcp.f32 %v1972_v27  ;;  %v1437_v26 = vpop.eup %1436  ;;  %v699_v3 = vsel %vm1991_vm9, %v698_v14, %v694_v2  ;;  %v724_v13 = vsel %vm2055_vm11, %v1433_v23, %v720_v60  ;;  %v734_v32 = vmul.f32 %v1435_v52, %v733_v21 }
  0x6b   : > { %v755_v15 = vand.u32 2147483647, %v1967_v24  ;;  %v714_v61 = vsel %vm1998_vm12, %v713_v46, %v709_v25  ;;  %v743_v11 = vor.u32 1.1754944e-38, %v742_v40  ;;  %v747_v9 = vmul.f32 %v1437_v26, %v1967_v24 }
  0x6c   : > { %vm751_vm8 = vweird.f32 %v1967_v24  ;;  %v735_v16 = vadd.f32 %v1435_v52, %v734_v32  ;;  %v757_v34 = vand.u32 2147483648, %v1967_v24  ;;  %v2089_v17 = vmul.f32 %v669_v18, %v1924_v5 }
  0x6d   : > { %v2092_v14 = vmul.f32 %v684_v36, %v1926_v45  ;;  %v729_v58 = vsel %vm2032_vm3, %v728_v20, %v724_v13  ;;  %v748_v35 = vsub.f32 1.0, %v747_v9  ;;  %vm752_vm9 = vweird.f32 %v1437_v26  ;;  %v862_v36 = vld [vmem:[%s2395_s6] sm:$0xff] }
  0x6e   : > { %v2097_v22 = vmul.f32 %v699_v3, %v1928_v12  ;;  %v739_v8 = vsel %vm2081_vm7, %v1435_v52, %v735_v16  ;;  %vm2101_vm10 = vcmp.eq.f32.partialorder %v755_v15, 8.507059e+37  ;;  %v2106_v5 = vmul.f32 %v714_v61, %v1930_v63  ;;  %vm2115_vm14 = vmor %vm751_vm8, %vm752_vm9  ;;  %883 = vmatpush.msra.mxu1 %v862_v36  ;;  %v1323_v12 = vld [vmem:[%s2397_s8 + $0x18] sm:$0xff] }
  0x6f   : > { %v784_v45 = vadd.f32 %v2092_v14, %v2089_v17  ;;  %v744_v0 = vsel %vm2060_vm13, %v743_v11, %v739_v8  ;;  %v749_v28 = vmul.f32 %v1437_v26, %v748_v35  ;;  %vm766_vm12 = vweird.f32 %v1972_v27 }
  0x70   : > { %v1439_v23 = vpop.eup %1438  ;;  %v758_v33 = vor.u32 1.1754944e-38, %v757_v34  ;;  %v2121_v29 = vmul.f32 %v729_v58, %v1932_v7  ;;  %v770_v31 = vand.u32 2147483647, %v1972_v27  ;;  %v772_v47 = vand.u32 2147483648, %v1972_v27 }
  0x71   : > { %v762_v63 = vmul.f32 %v1439_v23, %v1972_v27  ;;  %v785_v54 = vadd.f32 %v784_v45, %v2097_v22  ;;  %v750_v46 = vadd.f32 %v1437_v26, %v749_v28  ;;  %v1547_v48 = vmov 64.0   ;;  %v1327_v45 = vld [vmem:[%s2397_s8 + $0x38] sm:$0xff]  ;;  %v1324_v28 = vld [vmem:[%s2397_s8 + $0x20] sm:$0xff] }
  0x72   : > { %1440 = vrcp.f32 %v1547_v48  ;;  %vm767_vm15 = vweird.f32 %v1439_v23  ;;  %v2127_v1 = vmul.f32 %v744_v0, %v1934_v30  ;;  %v773_v59 = vor.u32 1.1754944e-38, %v772_v47  ;;  %988 = vmatpush.bf16.msrb.mxu1 %v1327_v45  ;;  %1347 = vmatpush.bf16.msra.mxu2 %v1327_v45  ;;  %v1325_v0 = vld [vmem:[%s2397_s8 + $0x28] sm:$0xff] }
  0x73   : > { %v763_v24 = vsub.f32 1.0, %v762_v63  ;;  %v786_v50 = vadd.f32 %v785_v54, %v2106_v5  ;;  %v754_v7 = vsel %vm2115_vm14, %v1437_v26, %v750_v46  ;;  %vm768_vm0 = vmor %vm766_vm12, %vm767_vm15  ;;  %vm771_vm1 = vcmp.eq.f32.partialorder %v770_v31, 8.507059e+37  ;;  %1348 = vmatpush.bf16.msra.mxu3 %v1327_v45  ;;  %v1321_v63 = vld [vmem:[%s2397_s8 + $0x8] sm:$0xff]  ;;  %v863_v54 = vld [vmem:[%s2396_s7] sm:$0x1] }
  0x74   : > { %v759_v51 = vsel %vm2101_vm10, %v758_v33, %v754_v7  ;;  %vm864_vm5 = vcmask 64512   ;;  %v1322_v33 = vld [vmem:[%s2397_s8 + $0x10] sm:$0xff]  ;;  %v1320_v46 = vld [vmem:[%s2397_s8] sm:$0xff] }
  0x75   : > { %v764_v52 = vmul.f32 %v1439_v23, %v763_v24  ;;  %v787_v53 = vadd.f32 %v786_v50, %v2121_v29  ;;  %v2138_v10 = vmul.f32 %v759_v51, %v1939_v37 }
  0x77   : > { %v765_v30 = vadd.f32 %v1439_v23, %v764_v52  ;;  %v788_v55 = vadd.f32 %v787_v53, %v2127_v1 }
  0x78   : > { %v1441_v56 = vpop.eup %1440 }
  0x79   : > { %v769_v38 = vsel %vm768_vm0, %v1439_v23, %v765_v30  ;;  %v789_v57 = vadd.f32 %v788_v55, %v2138_v10  ;;  %v798_v39 = vmul.f32 64.0, %v1441_v56  ;;  %vm802_vm2 = vweird.f32 %v1441_v56  ;;  %v1326_v23 = vld [vmem:[%s2397_s8 + $0x30] sm:$0xff] }
  0x7a   : > { %v774_v42 = vsel %vm771_vm1, %v773_v59, %v769_v38  ;;  %989 = vmatpush.bf16.msrb.mxu1 %v1326_v23  ;;  %1349 = vmatpush.bf16.msra.mxu2 %v1326_v23 }
  0x7b   : > { %v2143_v43 = vmul.f32 %v774_v42, %v1942_v49  ;;  %v799_v44 = vsub.f32 1.0, %v798_v39  ;;  %v821_v49 = vld [vmem:[%s2394_s5] sm:$0x1]  ;;  %1350 = vmatpush.bf16.msra.mxu3 %v1326_v23 }
  0x7d   : > { %v790_v27 = vadd.f32 %v789_v57, %v2143_v43  ;;  %v800_v19 = vmul.f32 %v1441_v56, %v799_v44 }
  0x7e   : > { %990 = vmatpush.bf16.msrb.mxu1 %v1325_v0  ;;  %1351 = vmatpush.bf16.msra.mxu2 %v1325_v0 }
  0x7f   : > { %v791_v2 = vrot.slane %v790_v27, 4  ;;  %v801_v20 = vadd.f32 %v1441_v56, %v800_v19  ;;  %1352 = vmatpush.bf16.msra.mxu3 %v1325_v0 }
  0x81   : > { %v792_v37 = vadd.f32 %v791_v2, %v790_v27  ;;  %v803_v21 = vsel %vm802_vm2, %v1441_v56, %v801_v20 }
  0x82   : > { %991 = vmatpush.bf16.msrb.mxu1 %v1324_v28  ;;  %1353 = vmatpush.bf16.msra.mxu2 %v1324_v28 }
  0x83   : > { %v793_v6 = vrot.slane %v792_v37, 2  ;;  %1354 = vmatpush.bf16.msra.mxu3 %v1324_v28 }
  0x85   : > { %v794_v40 = vadd.f32 %v793_v6, %v792_v37 }
  0x86   : > { %992 = vmatpush.bf16.msrb.mxu1 %v1323_v12  ;;  %1355 = vmatpush.bf16.msra.mxu2 %v1323_v12 }
  0x87   : > { %v795_v60 = vrot.slane %v794_v40, 1  ;;  %1356 = vmatpush.bf16.msra.mxu3 %v1323_v12 }
  0x89   : > { %v796_v62 = vadd.f32 %v795_v60, %v794_v40 }
  0x8a   : > { %993 = vmatpush.bf16.msrb.mxu1 %v1322_v33  ;;  %1357 = vmatpush.bf16.msra.mxu2 %v1322_v33 }
  0x8b   : > { %v804_v18 = vmul.f32 %v803_v21, %v796_v62  ;;  %1358 = vmatpush.bf16.msra.mxu3 %v1322_v33 }
  0x8d   : > { %838 = vmatmul.f32.vlgmr.msra.gmra.mxu0 %v804_v18 }
  0x8e   : > { %994 = vmatpush.bf16.msrb.mxu1 %v1321_v63  ;;  %1359 = vmatpush.bf16.msra.mxu2 %v1321_v63 }
  0x8f   : > { %1360 = vmatpush.bf16.msra.mxu3 %v1321_v63 }
  0x92   : > { %995 = vmatpush.bf16.msrb.mxu1 %v1320_v46  ;;  %1361 = vmatpush.bf16.msra.mxu2 %v1320_v46 }
  0x93   : > { %1362 = vmatpush.bf16.msra.mxu3 %v1320_v46 }
 0x10a   : > { %v839_v25 = vpop.f32.mrf.mxu0 }
 0x10b   : > { %v840_v26 = vadd.f32 %v839_v25, %v821_v49 }
 0x10d   : > { %v1274_v3 = vmul.f32 -1.442695, %v840_v26 }
 0x10f   : > { %1442 = vpow2.f32 %v1274_v3 }
 0x115   : > { %v1443_v13 = vpop.eup %1442 }
 0x116   : > { %v845_v32 = vadd.f32 1.0, %v1443_v13 }
 0x118   : > { %1444 = vrcp.f32 %v845_v32  ;;  %v857_v11 = vand.u32 2147483648, %v845_v32  ;;  %v855_v16 = vand.u32 2147483647, %v845_v32  ;;  %vm851_vm6 = vweird.f32 %v845_v32 }
 0x11a   : > { %v858_v58 = vor.u32 1.1754944e-38, %v857_v11  ;;  %vm856_vm11 = vcmp.eq.f32.partialorder %v855_v16, 8.507059e+37 }
 0x11e   : > { %v1445_v15 = vpop.eup %1444 }
 0x11f   : > { %v847_v61 = vmul.f32 %v1445_v15, %v845_v32  ;;  %vm852_vm3 = vweird.f32 %v1445_v15 }
 0x120   : > { %vm853_vm4 = vmor %vm851_vm6, %vm852_vm3 }
 0x121   : > { %v848_v4 = vsub.f32 1.0, %v847_v61 }
 0x123   : > { %v849_v9 = vmul.f32 %v1445_v15, %v848_v4 }
 0x125   : > { %v850_v34 = vadd.f32 %v1445_v15, %v849_v9 }
 0x127   : > { %v854_v35 = vsel %vm853_vm4, %v1445_v15, %v850_v34 }
 0x128   : > { %v859_v8 = vsel %vm856_vm11, %v858_v58, %v854_v35 }
 0x129   : > { %v861_v41 = vmul.f32 %v859_v8, %v840_v26 }
 0x12b   : > { %1275 = vmatmul.msk.f32.vlgmr.msra.gmra.mxu1 %vm864_vm5, %v861_v41 }
 0x1a8   : > { %v885_v31 = vpop.f32.mrf.mxu1 }
 0x1a9   : > { %v886_v47 = vadd.f32 %v885_v31, %v863_v54 }
 0x1ab   : > { %v1276_v48 = vmul.f32 -1.442695, %v886_v47 }
 0x1ad   : > { %1446 = vpow2.f32 %v1276_v48 }
 0x1b3   : > { %v1447_v24 = vpop.eup %1446 }
 0x1b4   : > { %v891_v50 = vadd.f32 1.0, %v1447_v24 }
 0x1b6   : > { %1448 = vrcp.f32 %v891_v50  ;;  %v903_v53 = vand.u32 2147483648, %v891_v50  ;;  %v901_v30 = vand.u32 2147483647, %v891_v50  ;;  %vm897_vm7 = vweird.f32 %v891_v50 }
 0x1b8   : > { %v904_v56 = vor.u32 1.1754944e-38, %v903_v53  ;;  %vm902_vm9 = vcmp.eq.f32.partialorder %v901_v30, 8.507059e+37 }
 0x1bc   : > { %v1449_v7 = vpop.eup %1448 }
 0x1bd   : > { %v893_v51 = vmul.f32 %v1449_v7, %v891_v50  ;;  %vm898_vm13 = vweird.f32 %v1449_v7 }
 0x1be   : > { %vm899_vm8 = vmor %vm897_vm7, %vm898_vm13 }
 0x1bf   : > { %v894_v52 = vsub.f32 1.0, %v893_v51 }
 0x1c1   : > { %v895_v59 = vmul.f32 %v1449_v7, %v894_v52 }
 0x1c3   : > { %v896_v55 = vadd.f32 %v1449_v7, %v895_v59 }
 0x1c5   : > { %v900_v38 = vsel %vm899_vm8, %v1449_v7, %v896_v55 }
 0x1c6   : > { %v905_v57 = vsel %vm902_vm9, %v904_v56, %v900_v38 }
 0x1c7   : > { %v907_v39 = vperm.slane %v905_v57, 0 }
 0x1c9   : > { %v908_v42 = vmul.f32 %v907_v39, %v2089_v17  ;;  %v909_v44 = vmul.f32 %v907_v39, %v2092_v14  ;;  %v910_v27 = vmul.f32 %v907_v39, %v2097_v22  ;;  %v911_v2 = vmul.f32 %v907_v39, %v2106_v5  ;;  %v2190_v14 = vld [vmem:[%s2398_s9] ss:$0 sm:$0xff] }
 0x1ca   : > { %v912_v19 = vmul.f32 %v907_v39, %v2121_v29  ;;  %v913_v37 = vmul.f32 %v907_v39, %v2127_v1  ;;  %v914_v60 = vmul.f32 %v907_v39, %v2138_v10  ;;  %v915_v17 = vmul.f32 %v907_v39, %v2143_v43 }
 0x1cb   : > { %v916_v6 = vpack.c.bf16 %v909_v44, %v908_v42  ;;  %v917_v20 = vpack.c.bf16 %v911_v2, %v910_v27 }
 0x1cc   : > { %v918_v40 = vpack.c.bf16 %v913_v37, %v912_v19  ;;  %v919_v21 = vpack.c.bf16 %v915_v17, %v914_v60 }
 0x1cd   : > { %996 = vmatmul.bf16.vlgmr.msrb.gmra.mxu1 %v916_v6  ;;  %1001 = vmatmul.bf16.vlgmr.msra.gmra.mxu2 %v917_v20 }
 0x1ce   : > { %1006 = vmatmul.bf16.vlgmr.msra.gmra.mxu3 %v918_v40 }
 0x1de   : > { %1011 = vmatmul.bf16.gmra.mxu3 %v919_v21 }
 0x24a   : > { %v997_v22 = vpop.f32.mrf.mxu1 }
 0x24b   : > { %v2193_v5 = vadd.f32 %v2190_v14, %v997_v22 }
 0x24d   : > { %v1309_v29 = vmul.f32 -1.442695, %v2193_v5 }
 0x24f   : > { %1450 = vpow2.f32 %v1309_v29 }
 0x250   : > { %v1002_v1 = vpop.f32.mrf.mxu2 }
 0x251   : > { %v2197_v62 = vadd.f32 %v2190_v14, %v1002_v1  ;;  %v1007_v10 = vpop.f32.mrf.mxu3 }
 0x252   : > { %v2200_v43 = vadd.f32 %v2190_v14, %v1007_v10  ;;  %v999_v18 = vpop.f32.mrf.mxu1 }
 0x253   : > { %v1311_v49 = vmul.f32 -1.442695, %v2197_v62  ;;  %v2204_v36 = vadd.f32 %v2190_v14, %v999_v18 }
 0x254   : > { %v1313_v25 = vmul.f32 -1.442695, %v2200_v43 }
 0x255   : > { %v1451_v26 = vpop.eup %1450  ;;  %1452 = vpow2.f32 %v1311_v49  ;;  %v1310_v3 = vmul.f32 -1.442695, %v2204_v36 }
 0x256   : > { %v2208_v13 = vadd.f32 1.0, %v1451_v26  ;;  %1454 = vpow2.f32 %v1313_v25 }
 0x257   : > { %1456 = vpow2.f32 %v1310_v3 }
 0x258   : > { %1458 = vrcp.f32 %v2208_v13  ;;  %v1004_v32 = vpop.f32.mrf.mxu2  ;;  %v1058_v24 = vand.u32 2147483647, %v2208_v13  ;;  %vm1054_vm10 = vweird.f32 %v2208_v13  ;;  %v1060_v30 = vand.u32 2147483648, %v2208_v13 }
 0x259   : > { %v2212_v15 = vadd.f32 %v2190_v14, %v1004_v32  ;;  %v1009_v61 = vpop.f32.mrf.mxu3 }
 0x25a   : > { %v2215_v4 = vadd.f32 %v2190_v14, %v1009_v61  ;;  %vm2251_vm12 = vcmp.eq.f32.partialorder %v1058_v24, 8.507059e+37 }
 0x25b   : > { %v1453_v11 = vpop.eup %1452  ;;  %v1312_v9 = vmul.f32 -1.442695, %v2212_v15 }
 0x25c   : > { %v1455_v16 = vpop.eup %1454  ;;  %v2218_v34 = vadd.f32 1.0, %v1453_v11  ;;  %v1314_v35 = vmul.f32 -1.442695, %v2215_v4 }
 0x25d   : > { %v1457_v58 = vpop.eup %1456  ;;  %1460 = vpow2.f32 %v1312_v9  ;;  %v2224_v41 = vadd.f32 1.0, %v1455_v16 }
 0x25e   : > { %v2221_v8 = vpop.eup %1458  ;;  %1462 = vrcp.f32 %v2218_v34  ;;  %v1042_v23 = vadd.f32 1.0, %v1457_v58  ;;  %v1088_v38 = vand.u32 2147483647, %v2218_v34  ;;  %v1090_v37 = vand.u32 2147483648, %v2218_v34 }
 0x25f   : > { %v1050_v45 = vmul.f32 %v2221_v8, %v2208_v13  ;;  %1464 = vpow2.f32 %v1314_v35  ;;  %vm1055_vm14 = vweird.f32 %v2221_v8  ;;  %v1061_v13 = vor.u32 1.1754944e-38, %v1060_v30 }
 0x260   : > { %1466 = vrcp.f32 %v2224_v41  ;;  %v1075_v27 = vand.u32 2147483648, %v1042_v23  ;;  %vm1069_vm0 = vweird.f32 %v1042_v23  ;;  %v1073_v40 = vand.u32 2147483647, %v1042_v23  ;;  %vm2270_vm1 = vmor %vm1054_vm10, %vm1055_vm14 }
 0x261   : > { %v1012_v0 = vpop.f32.mrf.mxu3  ;;  %1468 = vrcp.f32 %v1042_v23  ;;  %v1051_v54 = vsub.f32 1.0, %v1050_v45  ;;  %vm1084_vm11 = vweird.f32 %v2218_v34  ;;  %vm1089_vm7 = vcmp.eq.f32.partialorder %v1088_v38, 8.507059e+37 }
 0x262   : > { %v2230_v28 = vadd.f32 %v2190_v14, %v1012_v0  ;;  %v1076_v18 = vor.u32 1.1754944e-38, %v1075_v27  ;;  %vm1074_vm6 = vcmp.eq.f32.partialorder %v1073_v40, 8.507059e+37  ;;  %v1091_v45 = vor.u32 1.1754944e-38, %v1090_v37 }
 0x263   : > { %v1461_v12 = vpop.eup %1460  ;;  %v1052_v51 = vmul.f32 %v2221_v8, %v1051_v54  ;;  %v1120_v54 = vand.u32 2147483648, %v2224_v41 }
 0x264   : > { %v2232_v33 = vpop.eup %1462  ;;  %v2234_v63 = vadd.f32 1.0, %v1461_v12  ;;  %v1315_v46 = vmul.f32 -1.442695, %v2230_v28 }
 0x265   : > { %v1080_v31 = vmul.f32 %v2232_v33, %v2218_v34  ;;  %v1465_v47 = vpop.eup %1464  ;;  %v1053_v44 = vadd.f32 %v2221_v8, %v1052_v51  ;;  %vm1085_vm2 = vweird.f32 %v2232_v33  ;;  %v1121_v38 = vor.u32 1.1754944e-38, %v1120_v54 }
 0x266   : > { %1470 = vrcp.f32 %v2234_v63  ;;  %v2240_v48 = vpop.eup %1466  ;;  %v2243_v50 = vadd.f32 1.0, %v1465_v47  ;;  %v1105_v9 = vand.u32 2147483648, %v2234_v63  ;;  %vm2296_vm5 = vmor %vm1084_vm11, %vm1085_vm2  ;;  %vm1099_vm13 = vweird.f32 %v2234_v63 }
 0x267   : > { %v1469_v7 = vpop.eup %1468  ;;  %1472 = vpow2.f32 %v1315_v46  ;;  %v1081_v53 = vsub.f32 1.0, %v1080_v31  ;;  %v1110_v57 = vmul.f32 %v2240_v48, %v2224_v41  ;;  %v1057_v10 = vsel %vm2270_vm1, %v2221_v8, %v1053_v44 }
 0x268   : > { %v1065_v59 = vmul.f32 %v1469_v7, %v1042_v23  ;;  %1474 = vrcp.f32 %v2243_v50  ;;  %vm1070_vm15 = vweird.f32 %v1469_v7  ;;  %v1062_v16 = vsel %vm2251_vm12, %v1061_v13, %v1057_v10 }
 0x269   : > { %v1014_v52 = vpop.f32.mrf.mxu3  ;;  %v1082_v19 = vmul.f32 %v2232_v33, %v1081_v53  ;;  %vm1071_vm3 = vmor %vm1069_vm0, %vm1070_vm15  ;;  %v1103_v35 = vand.u32 2147483647, %v2234_v63  ;;  %v1118_v23 = vand.u32 2147483647, %v2224_v41  ;;  %vm1115_vm9 = vweird.f32 %v2240_v48 }
 0x26a   : > { %v1066_v39 = vsub.f32 1.0, %v1065_v59  ;;  %v2259_v42 = vadd.f32 %v2190_v14, %v1014_v52  ;;  %v1111_v14 = vsub.f32 1.0, %v1110_v57  ;;  %v1169_v31 = vmul.f32 %v1062_v16, %v2193_v5 }
 0x26b   : > { %v1083_v25 = vadd.f32 %v2232_v33, %v1082_v19  ;;  %v1106_v24 = vor.u32 1.1754944e-38, %v1105_v9  ;;  %vm1104_vm10 = vcmp.eq.f32.partialorder %v1103_v35, 8.507059e+37  ;;  %vm1114_vm12 = vweird.f32 %v2224_v41 }
 0x26c   : > { %v2249_v55 = vpop.eup %1470  ;;  %v1067_v6 = vmul.f32 %v1469_v7, %v1066_v39  ;;  %v1316_v17 = vmul.f32 -1.442695, %v2259_v42  ;;  %v1112_v61 = vmul.f32 %v2240_v48, %v1111_v14  ;;  %vm2323_vm14 = vmor %vm1114_vm12, %vm1115_vm9  ;;  %vm2327_vm15 = vcmp.eq.f32.partialorder %v1118_v23, 8.507059e+37 }
 0x26d   : > { %v1095_v2 = vmul.f32 %v2249_v55, %v2234_v63  ;;  %v1473_v20 = vpop.eup %1472  ;;  %vm1100_vm4 = vweird.f32 %v2249_v55  ;;  %v1087_v34 = vsel %vm2296_vm5, %v2232_v33, %v1083_v25  ;;  %vm1129_vm2 = vweird.f32 %v2243_v50 }
 0x26e   : > { %v1068_v22 = vadd.f32 %v1469_v7, %v1067_v6  ;;  %v2275_v29 = vadd.f32 1.0, %v1473_v20  ;;  %v2277_v1 = vpop.eup %1474  ;;  %1476 = vpow2.f32 %v1316_v17  ;;  %vm2306_vm8 = vmor %vm1099_vm13, %vm1100_vm4  ;;  %v1113_v47 = vadd.f32 %v2240_v48, %v1112_v61 }
 0x26f   : > { %v1096_v60 = vsub.f32 1.0, %v1095_v2  ;;  %v1125_v3 = vmul.f32 %v2277_v1, %v2243_v50  ;;  %v1092_v51 = vsel %vm1089_vm7, %v1091_v45, %v1087_v34  ;;  %vm1130_vm0 = vweird.f32 %v2277_v1 }
 0x270   : > { %v1072_v26 = vsel %vm1071_vm3, %v1469_v7, %v1068_v22  ;;  %1478 = vrcp.f32 %v2275_v29  ;;  %v1171_v56 = vmul.f32 %v1092_v51, %v2197_v62  ;;  %v1117_v41 = vsel %vm2323_vm14, %v2240_v48, %v1113_v47  ;;  %vm2342_vm3 = vmor %vm1129_vm2, %vm1130_vm0 }
 0x271   : > { %v1097_v49 = vmul.f32 %v2249_v55, %v1096_v60  ;;  %v1077_v11 = vsel %vm1074_vm6, %v1076_v18, %v1072_v26  ;;  %v1126_v8 = vsub.f32 1.0, %v1125_v3  ;;  %v1133_v27 = vand.u32 2147483647, %v2243_v50 }
 0x272   : > { %v1170_v63 = vmul.f32 %v1077_v11, %v2204_v36  ;;  %v1135_v2 = vand.u32 2147483648, %v2243_v50  ;;  %v1150_v62 = vand.u32 2147483648, %v2275_v29  ;;  %vm1144_vm6 = vweird.f32 %v2275_v29 }
 0x273   : > { %v1098_v32 = vadd.f32 %v2249_v55, %v1097_v49  ;;  %v1127_v52 = vmul.f32 %v2277_v1, %v1126_v8  ;;  %v1122_v20 = vsel %vm2327_vm15, %v1121_v38, %v1117_v41  ;;  %vm1134_vm11 = vcmp.eq.f32.partialorder %v1133_v27, 8.507059e+37 }
 0x274   : > { %v1477_v12 = vpop.eup %1476  ;;  %v1177_v30 = vadd.f32 %v1170_v63, %v1169_v31  ;;  %v1136_v21 = vor.u32 1.1754944e-38, %v1135_v2  ;;  %v1151_v14 = vor.u32 1.1754944e-38, %v1150_v62  ;;  %v1173_v22 = vmul.f32 %v1122_v20, %v2200_v43 }
 0x275   : > { %v1102_v46 = vsel %vm2306_vm8, %v2249_v55, %v1098_v32  ;;  %v1048_v7 = vadd.f32 1.0, %v1477_v12  ;;  %v1128_v39 = vadd.f32 %v2277_v1, %v1127_v52 }
 0x276   : > { %v1479_v33 = vpop.eup %1478  ;;  %v1107_v36 = vsel %vm1104_vm10, %v1106_v24, %v1102_v46  ;;  %v1178_v19 = vadd.f32 %v1177_v30, %v1171_v56 }
 0x277   : > { %v1140_v53 = vmul.f32 %v1479_v33, %v2275_v29  ;;  %1480 = vrcp.f32 %v1048_v7  ;;  %v1172_v57 = vmul.f32 %v1107_v36, %v2212_v15  ;;  %vm1145_vm1 = vweird.f32 %v1479_v33 }
 0x278   : > { %v1148_v15 = vand.u32 2147483647, %v2275_v29  ;;  %vm1146_vm4 = vmor %vm1144_vm6, %vm1145_vm1  ;;  %v1132_v50 = vsel %vm2342_vm3, %v2277_v1, %v1128_v39  ;;  %v1165_v49 = vand.u32 2147483648, %v1048_v7  ;;  %v1163_v3 = vand.u32 2147483647, %v1048_v7 }
 0x279   : > { %v1141_v55 = vsub.f32 1.0, %v1140_v53  ;;  %v1179_v40 = vadd.f32 %v1178_v19, %v1172_v57  ;;  %v1137_v29 = vsel %vm1134_vm11, %v1136_v21, %v1132_v50  ;;  %vm1159_vm7 = vweird.f32 %v1048_v7 }
 0x27a   : > { %vm1149_vm5 = vcmp.eq.f32.partialorder %v1148_v15, 8.507059e+37  ;;  %v1174_v13 = vmul.f32 %v1137_v29, %v2215_v4  ;;  %v1166_v43 = vor.u32 1.1754944e-38, %v1165_v49  ;;  %vm1164_vm9 = vcmp.eq.f32.partialorder %v1163_v3, 8.507059e+37 }
 0x27b   : > { %v1142_v44 = vmul.f32 %v1479_v33, %v1141_v55  ;;  %v1180_v25 = vadd.f32 %v1179_v40, %v1173_v22 }
 0x27d   : > { %v1143_v37 = vadd.f32 %v1479_v33, %v1142_v44  ;;  %v1481_v6 = vpop.eup %1480  ;;  %v1181_v61 = vadd.f32 %v1180_v25, %v1174_v13 }
 0x27e   : > { %v1155_v17 = vmul.f32 %v1481_v6, %v1048_v7  ;;  %vm1160_vm13 = vweird.f32 %v1481_v6 }
 0x27f   : > { %v1147_v60 = vsel %vm1146_vm4, %v1479_v33, %v1143_v37  ;;  %vm1161_vm8 = vmor %vm1159_vm7, %vm1160_vm13 }
 0x280   : > { %v1156_v10 = vsub.f32 1.0, %v1155_v17  ;;  %v1152_v18 = vsel %vm1149_vm5, %v1151_v14, %v1147_v60 }
 0x281   : > { %v1175_v1 = vmul.f32 %v1152_v18, %v2230_v28 }
 0x282   : > { %v1157_v26 = vmul.f32 %v1481_v6, %v1156_v10 }
 0x283   : > { %v1182_v16 = vadd.f32 %v1181_v61, %v1175_v1 }
 0x284   : > { %v1158_v32 = vadd.f32 %v1481_v6, %v1157_v26 }
 0x286   : > { %v1162_v11 = vsel %vm1161_vm8, %v1481_v6, %v1158_v32 }
 0x287   : > { %v1167_v9 = vsel %vm1164_vm9, %v1166_v43, %v1162_v11 }
 0x288   : > { %v1176_v58 = vmul.f32 %v1167_v9, %v2259_v42 }
 0x28a   : > { %v1183_v35 = vadd.f32 %v1182_v16, %v1176_v58 }
 0x28c   : > { %v1184_v8 = vrot.slane %v1183_v35, 4 }
 0x28e   : > { %v1185_v34 = vadd.f32 %v1184_v8, %v1183_v35 }
 0x290   : > { %v1186_v45 = vrot.slane %v1185_v34, 2 }
 0x292   : > { %v1187_v4 = vadd.f32 %v1186_v45, %v1185_v34 }
 0x294   : > { %v1188_v28 = vrot.slane %v1187_v4, 1 }
 0x296   : > { %v1189_v23 = vadd.f32 %v1188_v28, %v1187_v4 }
 0x298   : > { %v1190_v0 = vmul.f32 0.015625, %v1189_v23 }
 0x29a   : > { %1191 = vst [vmem:[%s351_s12] sm:$0x1] %v1190_v0 }
 0x29b   : > { %1509 = shalt.err (!%p1506_p3)
}
 0x29c   : > { %1363 = dma.vmem_to_hbm [thread:$0]  (%p1641_p5), %s1204_s18, 16, %s1206_s20, %s1193_s21  }
 0x29d PF: > { %p1369_p4 = scmp.ge.s32.totalorder %s1544_s16, 2  ;;  %s1217_s28 = sand.u32 1, %s1532_s13  }
 0x29e   : > { %s1218_s11 = scalar_lea.sflag [#allocation4], %s1217_s28 }
 0x29f   : > { %p1366_p7 = pnand %p1369_p4, %p1645_p6 }
 0x2a1   : > { %p1367_p8 = pneg %p1366_p7 }
 0x2a3   : > { %1527 = dma.done.wait (%p1367_p8), %s1218_s11, 16  }
 0x2a4   : > { %1529 = vsyncadd (%p1367_p8), %s1218_s11, 4294967280  ;;  %p20_p9 = scmp.ge.s32.totalorder %s1628_s19, 4   ;;  %s2446_s13 = smov %s1536_s14 }
 0x2a5   : > { %s2447_s14 = smov %s1540_s15  ;;  %s2448_s15 = smov %s1639_s22 }
 0x2a6   : > { %s2449_s16 = smov %s1628_s19  ;;  %22 = sbr.rel (!%p20_p9) target bundleno = 5 (0x5), region = 97 }
 0x2ab   :  { %1223 = vsyncpa [#allocation4], 1 }
 0x2ac   :  { %1225 = vsyncpa [#allocation4 + $0x1], 1 }

</bundles_post_ra>
